<compile_context>
chip_gen: v7x
topology: tpu7x:2x2x1
jax: 0.10.0
libtpu: 0.0.40
codegen_flags: <defaults>
</compile_context>

<pallas_src>
import functools

import jax
import jax.numpy as jnp
from jax import lax
from jax.experimental import pallas as pl
from jax.experimental.pallas import tpu as pltpu

EPS = 1e-5  # PyTorch InstanceNorm2d default eps


def _rup(x, m):
    return (x + m - 1) // m * m


def _pvec_layout(C, nb):
    """Row layout of the packed small-parameter array (sections 8-row aligned)."""
    C13p = _rup(C + 13, 8)           # padded (feat + bins) channel count per image
    nbins = C13p - C                 # bin channels incl. zero padding
    o_ins = 0                        # gamma/beta of the first InstanceNorm
    o_cvec = o_ins + _rup(nb * C13p, 8)   # per-output-channel params (9 columns)
    o_cut = o_cvec + _rup(nb * C, 8)      # distance-bin cutoffs
    o_bxyz = o_cut + _rup(nbins, 8)       # toxyz bias
    rows = o_bxyz + _rup(nb * 3, 8)
    return C13p, nbins, o_ins, o_cvec, o_cut, o_bxyz, rows


def _elu(x):
    # ELU(alpha=1): x if x>0 else exp(x)-1  (min() keeps the unused branch finite)
    return jnp.where(x > 0, x, jnp.exp(jnp.minimum(x, 0.0)) - 1.0)


def _inorm(x, gamma, beta):
    # InstanceNorm per row (= per image,channel) over the lane (pixel) axis.
    # var = E[x^2] - mu^2 keeps the two cross-lane reductions independent.
    mu = jnp.mean(x, axis=-1, keepdims=True)
    mu2 = jnp.mean(x * x, axis=-1, keepdims=True)
    var = jnp.maximum(mu2 - mu * mu, 0.0)
    return (x - mu) * (lax.rsqrt(var + EPS) * gamma) + beta


def preddxyz_kernel(C, nb, H, W,
                    feat_ref, cad_ref, pvec_ref, wconv_ref, w3a_ref, w3b_ref,
                    wxyz_ref, mask_ref,
                    xyz_ref, out_ref):
    HW = H * W
    C13p, nbins, o_ins, o_cvec, o_cut, o_bxyz, _ = _pvec_layout(C, nb)
    NC = nb * C
    NC13 = nb * C13p

    # ---- packed small parameters -------------------------------------------------
    pv = pvec_ref[...]                                      # (rows, 9) f32
    g_ins = pv[o_ins:o_ins + NC13, 0:1]
    b_ins = pv[o_ins:o_ins + NC13, 1:2]
    cvec = pv[o_cvec:o_cvec + NC, :]
    cut = pv[o_cut:o_cut + nbins, 0:1]                      # (nbins, 1)
    b_xyz = pv[o_bxyz:o_bxyz + nb * 3, 0:1]

    b_conv = cvec[:, 0:1]
    g1, be1 = cvec[:, 1:2], cvec[:, 2:3]
    b3a = cvec[:, 3:4]
    g2, be2 = cvec[:, 4:5], cvec[:, 5:6]
    b3b = cvec[:, 6:7]
    g3, be3 = cvec[:, 7:8], cvec[:, 8:9]

    masks = mask_ref[...]                                   # (4, HW) f32
    row_up, row_dn = masks[0:1, :], masks[1:2, :]
    col_lt, col_rt = masks[2:3, :], masks[3:4, :]

    # ---- build [feat ; bins] per folded image (channels on sublanes) -------------
    feat = feat_ref[...]                                    # (NC, HW)
    cad = cad_ref[...]                                      # (nb, HW)
    pieces = []
    for n in range(nb):
        pieces.append(feat[n * C:(n + 1) * C, :])
        pieces.append((cad[n:n + 1, :] <= cut).astype(jnp.float32))   # (nbins, HW)
    xin = jnp.concatenate(pieces, axis=0)                   # (NC13, HW)

    # self.ins : InstanceNorm2d(C+13, affine)
    xin = _inorm(xin, g_ins, b_ins)

    # self.conv : 1x1 conv == block-diagonal channel matmul (bf16 ops, f32 acc)
    h0 = jnp.dot(wconv_ref[...], xin.astype(jnp.bfloat16),
                 preferred_element_type=jnp.float32) + b_conv         # (NC, HW)

    def conv3x3(t, w_ref, b):
        # 9-tap stack via 4 XLU rolls: 2 row-shift rolls, then 2 column-shift rolls
        # of the stacked block.  Out-of-image taps are zeroed by the boundary masks
        # (row mask validity implies same row, so factored masking is exact).
        up = pltpu.roll(t, W, 1) * row_up                   # tap (r-1, c)
        dn = pltpu.roll(t, HW - W, 1) * row_dn              # tap (r+1, c)
        blk = jnp.concatenate([up, t, dn], axis=0)          # (3NC, HW), dy = -1,0,+1
        lt = (pltpu.roll(blk, 1, 1) * col_lt).astype(jnp.bfloat16)        # dx = -1
        rt = (pltpu.roll(blk, HW - 1, 1) * col_rt).astype(jnp.bfloat16)   # dx = +1
        stack = jnp.concatenate([lt, blk.astype(jnp.bfloat16), rt], axis=0)  # (9NC, HW)
        return jnp.dot(w_ref[...], stack,
                       preferred_element_type=jnp.float32) + b        # (NC, HW)

    # self.block  (Dropout == identity in eval mode)
    t = _elu(_inorm(h0, g1, be1))
    t = conv3x3(t, w3a_ref, b3a)
    t = _elu(_inorm(t, g2, be2))
    t = conv3x3(t, w3b_ref, b3b)
    h1 = t + h0                                             # residual add

    # self.nad
    h2 = _elu(_inorm(h1, g3, be3))
    out_ref[...] = h2

    # self.todxyz : 1x1 conv to 3 channels (block-diagonal over folded images)
    xyz_ref[...] = jnp.dot(wxyz_ref[...], h2.astype(jnp.bfloat16),
                           preferred_element_type=jnp.float32) + b_xyz


def preddxyz_forward(feat, cadist, kp):
    N, C, H, W = feat.shape
    nb = kp["nb"]
    assert nb == N, "params were prepared for a different batch fold"
    HW = H * W
    NC = nb * C

    feat2 = feat.reshape(N * C, HW)          # rows ordered (image, channel)
    cad2 = cadist.reshape(N, HW)

    def rep(shape):                          # resident (grid-invariant) block
        return pl.BlockSpec(shape, lambda g, z=(0,) * len(shape): z)

    in_specs = (
        pl.BlockSpec((NC, HW), lambda g: (g, 0)),   # feat channels for this chunk
        pl.BlockSpec((nb, HW), lambda g: (g, 0)),   # cadistavg rows
        rep(kp["pvec"].shape),                      # packed small f32 params
        rep(kp["w_conv"].shape),                    # block-diag 1x1 conv (bf16)
        rep(kp["w3a"].shape),                       # fused 3x3 conv a (bf16)
        rep(kp["w3b"].shape),                       # fused 3x3 conv b (bf16)
        rep(kp["w_xyz"].shape),                     # block-diag toxyz (bf16)
        rep(kp["masks"].shape),                     # row/col boundary masks (f32)
    )
    out_specs = (
        pl.BlockSpec((nb * 3, HW), lambda g: (g, 0)),
        pl.BlockSpec((NC, HW), lambda g: (g, 0)),
    )
    out_shape = (
        jax.ShapeDtypeStruct((N * 3, HW), jnp.float32),
        jax.ShapeDtypeStruct((N * C, HW), jnp.float32),
    )

    call = pl.pallas_call(
        functools.partial(preddxyz_kernel, C, nb, H, W),
        grid=(N // nb,),                            # whole batch folded -> 1 step
        in_specs=in_specs,
        out_specs=out_specs,
        out_shape=out_shape,
        compiler_params=pltpu.CompilerParams(
            dimension_semantics=("parallel",)),
    )
    xyz2, out2 = call(feat2, cad2, kp["pvec"], kp["w_conv"], kp["w3a"],
                      kp["w3b"], kp["w_xyz"], kp["masks"])
    return xyz2.reshape(N, 3, H, W), out2.reshape(N, C, H, W)


def _block_diag(w, nb):
    """(O, I) -> (nb*O, nb*I) block-diagonal (same weight for every folded image)."""
    O, I = w.shape
    out = jnp.zeros((nb, O, nb, I), w.dtype)
    for n in range(nb):
        out = out.at[n, :, n, :].set(w)
    return out.reshape(nb * O, nb * I)


def _fuse3x3_block_diag(w, nb):
    """(O, I, kh, kw) -> (nb*O, 9*nb*I), columns ordered (kw, kh, image, in-channel)
    to match the tap stack built in the kernel (dx-major, dy-minor, image, channel)."""
    O, I, _, _ = w.shape
    wt = jnp.transpose(w, (0, 3, 2, 1))             # (O, kw, kh, I)
    out = jnp.zeros((nb, O, 3, 3, nb, I), w.dtype)
    for n in range(nb):
        out = out.at[n, :, :, :, n, :].set(wt)
    return out.reshape(nb * O, 9 * nb * I)


def prepare_params(p, N, H, W):
    """One-time layout/dtype prep of raw f32 params into kernel-ready arrays."""
    nb = N
    C = p["w_conv"].shape[0]
    HW = H * W
    C13p, nbins, o_ins, o_cvec, o_cut, o_bxyz, rows = _pvec_layout(C, nb)
    kp = {"nb": nb}

    # ---- packed small f32 params -------------------------------------------------
    pvec = jnp.zeros((rows, 9), jnp.float32)
    pad = C13p - (C + 13)
    g_ins = jnp.concatenate([p["g_ins"], jnp.zeros((pad, 1), jnp.float32)], 0)
    b_ins = jnp.concatenate([p["b_ins"], jnp.zeros((pad, 1), jnp.float32)], 0)
    ins_ab = jnp.concatenate([g_ins, b_ins], axis=1)                       # (C13p, 2)
    pvec = pvec.at[o_ins:o_ins + nb * C13p, 0:2].set(jnp.tile(ins_ab, (nb, 1)))
    cvec = jnp.concatenate(
        [p["b_conv"], p["g1"], p["be1"], p["b_cnn1"],
         p["g2"], p["be2"], p["b_cnn2"], p["g3"], p["be3"]], axis=1)       # (C, 9)
    pvec = pvec.at[o_cvec:o_cvec + nb * C, :].set(jnp.tile(cvec, (nb, 1)))
    cut = jnp.concatenate(
        [jnp.arange(8.0, 33.0, 2.0, dtype=jnp.float32),
         jnp.full((nbins - 13,), -3.0e38, jnp.float32)]).reshape(nbins, 1)
    pvec = pvec.at[o_cut:o_cut + nbins, 0:1].set(cut)
    pvec = pvec.at[o_bxyz:o_bxyz + nb * 3, 0:1].set(jnp.tile(p["b_xyz"], (nb, 1)))
    kp["pvec"] = pvec

    # ---- weights (bf16, block-diagonal over folded images) -----------------------
    w_conv_p = jnp.concatenate(
        [p["w_conv"], jnp.zeros((C, pad), jnp.float32)], axis=1)           # (C, C13p)
    kp["w_conv"] = _block_diag(w_conv_p, nb).astype(jnp.bfloat16)          # (nbC, nbC13p)
    kp["w3a"] = _fuse3x3_block_diag(p["w_cnn1"], nb).astype(jnp.bfloat16)  # (nbC, 9nbC)
    kp["w3b"] = _fuse3x3_block_diag(p["w_cnn2"], nb).astype(jnp.bfloat16)
    kp["w_xyz"] = _block_diag(p["w_xyz"], nb).astype(jnp.bfloat16)         # (nb3, nbC)

    # ---- boundary-validity masks: row-1 / row+1 / col-1 / col+1 taps -------------
    row = jnp.arange(HW, dtype=jnp.int32) // W
    col = jnp.arange(HW, dtype=jnp.int32) % W
    kp["masks"] = jnp.stack(
        [(row >= 1), (row < H - 1), (col >= 1), (col < W - 1)],
        axis=0).astype(jnp.float32)                                        # (4, HW)
    return kp


def make_params(key, C):
    C13 = C + 13
    ks = jax.random.split(key, 16)
    f = lambda k, s: (0.1 * jax.random.normal(k, s)).astype(jnp.float32)
    p = {}
    p["g_ins"] = 1.0 + f(ks[0], (C13, 1)); p["b_ins"] = f(ks[1], (C13, 1))
    p["w_conv"] = f(ks[2], (C, C13));      p["b_conv"] = f(ks[3], (C, 1))
    p["g1"] = 1.0 + f(ks[4], (C, 1));      p["be1"] = f(ks[5], (C, 1))
    p["w_cnn1"] = f(ks[6], (C, C, 3, 3));  p["b_cnn1"] = f(ks[7], (C, 1))
    p["g2"] = 1.0 + f(ks[8], (C, 1));      p["be2"] = f(ks[9], (C, 1))
    p["w_cnn2"] = f(ks[10], (C, C, 3, 3)); p["b_cnn2"] = f(ks[11], (C, 1))
    p["g3"] = 1.0 + f(ks[12], (C, 1));     p["be3"] = f(ks[13], (C, 1))
    p["w_xyz"] = f(ks[14], (3, C));        p["b_xyz"] = f(ks[15], (3, 1))
    return p


def reference(feat, cadist, p):
    # Plain-JAX f32 reference mirroring the PyTorch forward (eval mode).
    cutoff = jnp.arange(8.0, 33.0, 2.0, dtype=jnp.float32).reshape(1, 13, 1, 1)
    bins = (cadist[:, None, :, :] <= cutoff).astype(jnp.float32)
    x = jnp.concatenate([feat, bins], axis=1)

    def inorm(v, g, b):
        mu = v.mean(axis=(2, 3), keepdims=True)
        var = ((v - mu) ** 2).mean(axis=(2, 3), keepdims=True)
        return (v - mu) * lax.rsqrt(var + EPS) * g.reshape(1, -1, 1, 1) + b.reshape(1, -1, 1, 1)

    def conv2d(v, w, b, pad):
        y = lax.conv_general_dilated(v, w, (1, 1), [(pad, pad), (pad, pad)],
                                     dimension_numbers=("NCHW", "OIHW", "NCHW"))
        return y + b.reshape(1, -1, 1, 1)

    elu = lambda v: jnp.where(v > 0, v, jnp.exp(jnp.minimum(v, 0.0)) - 1.0)
    C = p["w_conv"].shape[0]; C13 = p["w_conv"].shape[1]
    x = inorm(x, p["g_ins"], p["b_ins"])
    h0 = conv2d(x, p["w_conv"].reshape(C, C13, 1, 1), p["b_conv"], 0)
    t = elu(inorm(h0, p["g1"], p["be1"]))
    t = conv2d(t, p["w_cnn1"], p["b_cnn1"], 1)
    t = elu(inorm(t, p["g2"], p["be2"]))
    t = conv2d(t, p["w_cnn2"], p["b_cnn2"], 1)
    h1 = t + h0
    h2 = elu(inorm(h1, p["g3"], p["be3"]))
    xyz = conv2d(h2, p["w_xyz"].reshape(3, C, 1, 1), p["b_xyz"], 0)
    return xyz, h2


if __name__ == "__main__":
    key = jax.random.PRNGKey(0)
    C, N, H, W = 8, 2, 16, 16
    kf, kc, kw = jax.random.split(key, 3)
    feat = jax.random.normal(kf, (N, C, H, W), dtype=jnp.float32)
    cadist = jax.random.uniform(kc, (N, H, W), minval=2.0, maxval=38.0,
                                dtype=jnp.float32)
    params = make_params(kw, C)
    kparams = prepare_params(params, N, H, W)

    xyz, out = preddxyz_forward(feat, cadist, kparams)
    jax.block_until_ready((xyz, out))

    xyz_r, out_r = reference(feat, cadist, params)
    assert xyz.shape == (N, 3, H, W) and out.shape == (N, C, H, W)
    err_xyz = float(jnp.max(jnp.abs(xyz - xyz_r)))
    err_out = float(jnp.max(jnp.abs(out - out_r)))
    # bf16 MXU operands (f32 accumulate) vs f32 reference.
    assert err_xyz < 5e-2, err_xyz
    assert err_out < 5e-2, err_out
    print("KERNEL_OK")
</pallas_src>

<mosaic_0001>
module attributes {stable_mosaic.version = 11 : i64} {
  func.func @preddxyz_kernel(%arg0: i32, %arg1: memref<16x256xf32, #tpu.memory_space<vmem>>, %arg2: memref<2x256xf32, #tpu.memory_space<vmem>>, %arg3: memref<88x9xf32, #tpu.memory_space<vmem>>, %arg4: memref<16x48xbf16, #tpu.memory_space<vmem>>, %arg5: memref<16x144xbf16, #tpu.memory_space<vmem>>, %arg6: memref<16x144xbf16, #tpu.memory_space<vmem>>, %arg7: memref<6x16xbf16, #tpu.memory_space<vmem>>, %arg8: memref<4x256xf32, #tpu.memory_space<vmem>>, %arg9: memref<6x256xf32, #tpu.memory_space<vmem>>, %arg10: memref<16x256xf32, #tpu.memory_space<vmem>>) attributes {dimension_semantics = [#tpu.dimension_semantics<parallel>], iteration_bounds = array<i64: 1>, scalar_prefetch = 0 : i64, scratch_operands = 0 : i64, tpu.core_type = #tpu.core_type<tc>, window_params = [{transform_indices = @transform_0, window_bounds = array<i64: 16, 256>}, {transform_indices = @transform_1, window_bounds = array<i64: 2, 256>}, {pipeline_mode = #tpu.pipeline_mode<synchronous>, transform_indices = @transform_2, window_bounds = array<i64: 88, 9>}, {pipeline_mode = #tpu.pipeline_mode<synchronous>, transform_indices = @transform_3, window_bounds = array<i64: 16, 48>}, {pipeline_mode = #tpu.pipeline_mode<synchronous>, transform_indices = @transform_4, window_bounds = array<i64: 16, 144>}, {pipeline_mode = #tpu.pipeline_mode<synchronous>, transform_indices = @transform_5, window_bounds = array<i64: 16, 144>}, {pipeline_mode = #tpu.pipeline_mode<synchronous>, transform_indices = @transform_6, window_bounds = array<i64: 6, 16>}, {pipeline_mode = #tpu.pipeline_mode<synchronous>, transform_indices = @transform_7, window_bounds = array<i64: 4, 256>}, {transform_indices = @transform_8, window_bounds = array<i64: 6, 256>}, {transform_indices = @transform_9, window_bounds = array<i64: 16, 256>}]} {
    %c0 = arith.constant 0 : index
    %c0_0 = arith.constant 0 : index
    %0 = vector.load %arg3[%c0, %c0_0] : memref<88x9xf32, #tpu.memory_space<vmem>>, vector<88x9xf32>
    %1 = vector.extract_strided_slice %0 {offsets = [0, 0], sizes = [48, 1], strides = [1, 1]} : vector<88x9xf32> to vector<48x1xf32>
    %2 = vector.extract_strided_slice %0 {offsets = [0, 1], sizes = [48, 1], strides = [1, 1]} : vector<88x9xf32> to vector<48x1xf32>
    %3 = vector.extract_strided_slice %0 {offsets = [48, 0], sizes = [16, 9], strides = [1, 1]} : vector<88x9xf32> to vector<16x9xf32>
    %4 = vector.extract_strided_slice %0 {offsets = [64, 0], sizes = [16, 1], strides = [1, 1]} : vector<88x9xf32> to vector<16x1xf32>
    %5 = vector.extract_strided_slice %0 {offsets = [80, 0], sizes = [6, 1], strides = [1, 1]} : vector<88x9xf32> to vector<6x1xf32>
    %6 = vector.extract_strided_slice %3 {offsets = [0, 0], sizes = [16, 1], strides = [1, 1]} : vector<16x9xf32> to vector<16x1xf32>
    %7 = vector.extract_strided_slice %3 {offsets = [0, 1], sizes = [16, 1], strides = [1, 1]} : vector<16x9xf32> to vector<16x1xf32>
    %8 = vector.extract_strided_slice %3 {offsets = [0, 2], sizes = [16, 1], strides = [1, 1]} : vector<16x9xf32> to vector<16x1xf32>
    %9 = vector.extract_strided_slice %3 {offsets = [0, 3], sizes = [16, 1], strides = [1, 1]} : vector<16x9xf32> to vector<16x1xf32>
    %10 = vector.extract_strided_slice %3 {offsets = [0, 4], sizes = [16, 1], strides = [1, 1]} : vector<16x9xf32> to vector<16x1xf32>
    %11 = vector.extract_strided_slice %3 {offsets = [0, 5], sizes = [16, 1], strides = [1, 1]} : vector<16x9xf32> to vector<16x1xf32>
    %12 = vector.extract_strided_slice %3 {offsets = [0, 6], sizes = [16, 1], strides = [1, 1]} : vector<16x9xf32> to vector<16x1xf32>
    %13 = vector.extract_strided_slice %3 {offsets = [0, 7], sizes = [16, 1], strides = [1, 1]} : vector<16x9xf32> to vector<16x1xf32>
    %14 = vector.extract_strided_slice %3 {offsets = [0, 8], sizes = [16, 1], strides = [1, 1]} : vector<16x9xf32> to vector<16x1xf32>
    %c0_1 = arith.constant 0 : index
    %c0_2 = arith.constant 0 : index
    %15 = vector.load %arg8[%c0_1, %c0_2] : memref<4x256xf32, #tpu.memory_space<vmem>>, vector<4x256xf32>
    %16 = vector.extract_strided_slice %15 {offsets = [0, 0], sizes = [1, 256], strides = [1, 1]} : vector<4x256xf32> to vector<1x256xf32>
    %17 = vector.extract_strided_slice %15 {offsets = [1, 0], sizes = [1, 256], strides = [1, 1]} : vector<4x256xf32> to vector<1x256xf32>
    %18 = vector.extract_strided_slice %15 {offsets = [2, 0], sizes = [1, 256], strides = [1, 1]} : vector<4x256xf32> to vector<1x256xf32>
    %19 = vector.extract_strided_slice %15 {offsets = [3, 0], sizes = [1, 256], strides = [1, 1]} : vector<4x256xf32> to vector<1x256xf32>
    %c0_3 = arith.constant 0 : index
    %c0_4 = arith.constant 0 : index
    %20 = vector.load %arg1[%c0_3, %c0_4] : memref<16x256xf32, #tpu.memory_space<vmem>>, vector<16x256xf32>
    %c0_5 = arith.constant 0 : index
    %c0_6 = arith.constant 0 : index
    %21 = vector.load %arg2[%c0_5, %c0_6] : memref<2x256xf32, #tpu.memory_space<vmem>>, vector<2x256xf32>
    %22 = vector.extract_strided_slice %20 {offsets = [0, 0], sizes = [8, 256], strides = [1, 1]} : vector<16x256xf32> to vector<8x256xf32>
    %23 = vector.extract_strided_slice %21 {offsets = [0, 0], sizes = [1, 256], strides = [1, 1]} : vector<2x256xf32> to vector<1x256xf32>
    %24 = vector.broadcast %23 : vector<1x256xf32> to vector<16x256xf32>
    %25 = vector.broadcast %4 : vector<16x1xf32> to vector<16x256xf32>
    %26 = arith.cmpf ole, %24, %25 : vector<16x256xf32>
    %27 = arith.extui %26 : vector<16x256xi1> to vector<16x256xi32>
    %28 = arith.sitofp %27 : vector<16x256xi32> to vector<16x256xf32>
    %29 = vector.extract_strided_slice %20 {offsets = [8, 0], sizes = [8, 256], strides = [1, 1]} : vector<16x256xf32> to vector<8x256xf32>
    %30 = vector.extract_strided_slice %21 {offsets = [1, 0], sizes = [1, 256], strides = [1, 1]} : vector<2x256xf32> to vector<1x256xf32>
    %31 = vector.broadcast %30 : vector<1x256xf32> to vector<16x256xf32>
    %32 = vector.broadcast %4 : vector<16x1xf32> to vector<16x256xf32>
    %33 = arith.cmpf ole, %31, %32 : vector<16x256xf32>
    %34 = arith.extui %33 : vector<16x256xi1> to vector<16x256xi32>
    %35 = arith.sitofp %34 : vector<16x256xi32> to vector<16x256xf32>
    %36 = tpu.concatenate %22, %28, %29, %35 in 0 : vector<8x256xf32>, vector<16x256xf32>, vector<8x256xf32>, vector<16x256xf32> -> vector<48x256xf32>
    %cst = arith.constant dense<0.000000e+00> : vector<48xf32>
    %37 = vector.multi_reduction <add>, %36, %cst [1] : vector<48x256xf32> to vector<48xf32>
    %38 = vector.shape_cast %37 : vector<48xf32> to vector<48x1xf32>
    %cst_7 = arith.constant 2.560000e+02 : f32
    %39 = vector.broadcast %cst_7 : f32 to vector<48x1xf32>
    %40 = arith.divf %38, %39 : vector<48x1xf32>
    %41 = arith.mulf %36, %36 : vector<48x256xf32>
    %cst_8 = arith.constant dense<0.000000e+00> : vector<48xf32>
    %42 = vector.multi_reduction <add>, %41, %cst_8 [1] : vector<48x256xf32> to vector<48xf32>
    %43 = vector.shape_cast %42 : vector<48xf32> to vector<48x1xf32>
    %cst_9 = arith.constant 2.560000e+02 : f32
    %44 = vector.broadcast %cst_9 : f32 to vector<48x1xf32>
    %45 = arith.divf %43, %44 : vector<48x1xf32>
    %46 = arith.mulf %40, %40 : vector<48x1xf32>
    %47 = arith.subf %45, %46 : vector<48x1xf32>
    %cst_10 = arith.constant 0.000000e+00 : f32
    %48 = vector.broadcast %cst_10 : f32 to vector<48x1xf32>
    %49 = arith.maximumf %47, %48 : vector<48x1xf32>
    %50 = vector.broadcast %40 : vector<48x1xf32> to vector<48x256xf32>
    %51 = arith.subf %36, %50 : vector<48x256xf32>
    %cst_11 = arith.constant 9.99999974E-6 : f32
    %52 = vector.broadcast %cst_11 : f32 to vector<48x1xf32>
    %53 = arith.addf %49, %52 : vector<48x1xf32>
    %54 = math.rsqrt %53 : vector<48x1xf32>
    %55 = arith.mulf %54, %1 : vector<48x1xf32>
    %56 = vector.broadcast %55 : vector<48x1xf32> to vector<48x256xf32>
    %57 = arith.mulf %51, %56 : vector<48x256xf32>
    %58 = vector.broadcast %2 : vector<48x1xf32> to vector<48x256xf32>
    %59 = arith.addf %57, %58 : vector<48x256xf32>
    %c0_12 = arith.constant 0 : index
    %c0_13 = arith.constant 0 : index
    %60 = vector.load %arg4[%c0_12, %c0_13] : memref<16x48xbf16, #tpu.memory_space<vmem>>, vector<16x48xbf16>
    %61 = arith.truncf %59 : vector<48x256xf32> to vector<48x256xbf16>
    %cst_14 = arith.constant dense<0.000000e+00> : vector<16x256xf32>
    %62 = tpu.matmul %60, %61, %cst_14 {dimension_numbers = #tpu.dot_dimension_numbers<[1], [0], [0], [1], [0, 0, 1, 1], [], []>} : vector<16x48xbf16>, vector<48x256xbf16>, vector<16x256xf32> -> vector<16x256xf32>
    %63 = vector.broadcast %6 : vector<16x1xf32> to vector<16x256xf32>
    %64 = arith.addf %62, %63 : vector<16x256xf32>
    %cst_15 = arith.constant dense<0.000000e+00> : vector<16xf32>
    %65 = vector.multi_reduction <add>, %64, %cst_15 [1] : vector<16x256xf32> to vector<16xf32>
    %66 = vector.shape_cast %65 : vector<16xf32> to vector<16x1xf32>
    %cst_16 = arith.constant 2.560000e+02 : f32
    %67 = vector.broadcast %cst_16 : f32 to vector<16x1xf32>
    %68 = arith.divf %66, %67 : vector<16x1xf32>
    %69 = arith.mulf %64, %64 : vector<16x256xf32>
    %cst_17 = arith.constant dense<0.000000e+00> : vector<16xf32>
    %70 = vector.multi_reduction <add>, %69, %cst_17 [1] : vector<16x256xf32> to vector<16xf32>
    %71 = vector.shape_cast %70 : vector<16xf32> to vector<16x1xf32>
    %cst_18 = arith.constant 2.560000e+02 : f32
    %72 = vector.broadcast %cst_18 : f32 to vector<16x1xf32>
    %73 = arith.divf %71, %72 : vector<16x1xf32>
    %74 = arith.mulf %68, %68 : vector<16x1xf32>
    %75 = arith.subf %73, %74 : vector<16x1xf32>
    %cst_19 = arith.constant 0.000000e+00 : f32
    %76 = vector.broadcast %cst_19 : f32 to vector<16x1xf32>
    %77 = arith.maximumf %75, %76 : vector<16x1xf32>
    %78 = vector.broadcast %68 : vector<16x1xf32> to vector<16x256xf32>
    %79 = arith.subf %64, %78 : vector<16x256xf32>
    %cst_20 = arith.constant 9.99999974E-6 : f32
    %80 = vector.broadcast %cst_20 : f32 to vector<16x1xf32>
    %81 = arith.addf %77, %80 : vector<16x1xf32>
    %82 = math.rsqrt %81 : vector<16x1xf32>
    %83 = arith.mulf %82, %7 : vector<16x1xf32>
    %84 = vector.broadcast %83 : vector<16x1xf32> to vector<16x256xf32>
    %85 = arith.mulf %79, %84 : vector<16x256xf32>
    %86 = vector.broadcast %8 : vector<16x1xf32> to vector<16x256xf32>
    %87 = arith.addf %85, %86 : vector<16x256xf32>
    %cst_21 = arith.constant 0.000000e+00 : f32
    %88 = vector.broadcast %cst_21 : f32 to vector<16x256xf32>
    %89 = arith.cmpf ogt, %87, %88 : vector<16x256xf32>
    %cst_22 = arith.constant 0.000000e+00 : f32
    %90 = vector.broadcast %cst_22 : f32 to vector<16x256xf32>
    %91 = arith.minimumf %87, %90 : vector<16x256xf32>
    %92 = math.exp %91 : vector<16x256xf32>
    %cst_23 = arith.constant 1.000000e+00 : f32
    %93 = vector.broadcast %cst_23 : f32 to vector<16x256xf32>
    %94 = arith.subf %92, %93 : vector<16x256xf32>
    %95 = arith.select %89, %87, %94 : vector<16x256xi1>, vector<16x256xf32>
    %c16_i32 = arith.constant 16 : i32
    %96 = tpu.dynamic_rotate %95 by %c16_i32 dim 1 : vector<16x256xf32>, i32 -> vector<16x256xf32>
    %97 = vector.broadcast %16 : vector<1x256xf32> to vector<16x256xf32>
    %98 = arith.mulf %96, %97 : vector<16x256xf32>
    %c240_i32 = arith.constant 240 : i32
    %99 = tpu.dynamic_rotate %95 by %c240_i32 dim 1 : vector<16x256xf32>, i32 -> vector<16x256xf32>
    %100 = vector.broadcast %17 : vector<1x256xf32> to vector<16x256xf32>
    %101 = arith.mulf %99, %100 : vector<16x256xf32>
    %102 = tpu.concatenate %98, %95, %101 in 0 : vector<16x256xf32>, vector<16x256xf32>, vector<16x256xf32> -> vector<48x256xf32>
    %c1_i32 = arith.constant 1 : i32
    %103 = tpu.dynamic_rotate %102 by %c1_i32 dim 1 : vector<48x256xf32>, i32 -> vector<48x256xf32>
    %104 = vector.broadcast %18 : vector<1x256xf32> to vector<48x256xf32>
    %105 = arith.mulf %103, %104 : vector<48x256xf32>
    %106 = arith.truncf %105 : vector<48x256xf32> to vector<48x256xbf16>
    %c255_i32 = arith.constant 255 : i32
    %107 = tpu.dynamic_rotate %102 by %c255_i32 dim 1 : vector<48x256xf32>, i32 -> vector<48x256xf32>
    %108 = vector.broadcast %19 : vector<1x256xf32> to vector<48x256xf32>
    %109 = arith.mulf %107, %108 : vector<48x256xf32>
    %110 = arith.truncf %109 : vector<48x256xf32> to vector<48x256xbf16>
    %111 = arith.truncf %102 : vector<48x256xf32> to vector<48x256xbf16>
    %112 = tpu.concatenate %106, %111, %110 in 0 : vector<48x256xbf16>, vector<48x256xbf16>, vector<48x256xbf16> -> vector<144x256xbf16>
    %c0_24 = arith.constant 0 : index
    %c0_25 = arith.constant 0 : index
    %113 = vector.load %arg5[%c0_24, %c0_25] : memref<16x144xbf16, #tpu.memory_space<vmem>>, vector<16x144xbf16>
    %cst_26 = arith.constant dense<0.000000e+00> : vector<16x256xf32>
    %114 = tpu.matmul %113, %112, %cst_26 {dimension_numbers = #tpu.dot_dimension_numbers<[1], [0], [0], [1], [0, 0, 1, 1], [], []>} : vector<16x144xbf16>, vector<144x256xbf16>, vector<16x256xf32> -> vector<16x256xf32>
    %115 = vector.broadcast %9 : vector<16x1xf32> to vector<16x256xf32>
    %116 = arith.addf %114, %115 : vector<16x256xf32>
    %cst_27 = arith.constant dense<0.000000e+00> : vector<16xf32>
    %117 = vector.multi_reduction <add>, %116, %cst_27 [1] : vector<16x256xf32> to vector<16xf32>
    %118 = vector.shape_cast %117 : vector<16xf32> to vector<16x1xf32>
    %cst_28 = arith.constant 2.560000e+02 : f32
    %119 = vector.broadcast %cst_28 : f32 to vector<16x1xf32>
    %120 = arith.divf %118, %119 : vector<16x1xf32>
    %121 = arith.mulf %116, %116 : vector<16x256xf32>
    %cst_29 = arith.constant dense<0.000000e+00> : vector<16xf32>
    %122 = vector.multi_reduction <add>, %121, %cst_29 [1] : vector<16x256xf32> to vector<16xf32>
    %123 = vector.shape_cast %122 : vector<16xf32> to vector<16x1xf32>
    %cst_30 = arith.constant 2.560000e+02 : f32
    %124 = vector.broadcast %cst_30 : f32 to vector<16x1xf32>
    %125 = arith.divf %123, %124 : vector<16x1xf32>
    %126 = arith.mulf %120, %120 : vector<16x1xf32>
    %127 = arith.subf %125, %126 : vector<16x1xf32>
    %cst_31 = arith.constant 0.000000e+00 : f32
    %128 = vector.broadcast %cst_31 : f32 to vector<16x1xf32>
    %129 = arith.maximumf %127, %128 : vector<16x1xf32>
    %130 = vector.broadcast %120 : vector<16x1xf32> to vector<16x256xf32>
    %131 = arith.subf %116, %130 : vector<16x256xf32>
    %cst_32 = arith.constant 9.99999974E-6 : f32
    %132 = vector.broadcast %cst_32 : f32 to vector<16x1xf32>
    %133 = arith.addf %129, %132 : vector<16x1xf32>
    %134 = math.rsqrt %133 : vector<16x1xf32>
    %135 = arith.mulf %134, %10 : vector<16x1xf32>
    %136 = vector.broadcast %135 : vector<16x1xf32> to vector<16x256xf32>
    %137 = arith.mulf %131, %136 : vector<16x256xf32>
    %138 = vector.broadcast %11 : vector<16x1xf32> to vector<16x256xf32>
    %139 = arith.addf %137, %138 : vector<16x256xf32>
    %cst_33 = arith.constant 0.000000e+00 : f32
    %140 = vector.broadcast %cst_33 : f32 to vector<16x256xf32>
    %141 = arith.cmpf ogt, %139, %140 : vector<16x256xf32>
    %cst_34 = arith.constant 0.000000e+00 : f32
    %142 = vector.broadcast %cst_34 : f32 to vector<16x256xf32>
    %143 = arith.minimumf %139, %142 : vector<16x256xf32>
    %144 = math.exp %143 : vector<16x256xf32>
    %cst_35 = arith.constant 1.000000e+00 : f32
    %145 = vector.broadcast %cst_35 : f32 to vector<16x256xf32>
    %146 = arith.subf %144, %145 : vector<16x256xf32>
    %147 = arith.select %141, %139, %146 : vector<16x256xi1>, vector<16x256xf32>
    %c16_i32_36 = arith.constant 16 : i32
    %148 = tpu.dynamic_rotate %147 by %c16_i32_36 dim 1 : vector<16x256xf32>, i32 -> vector<16x256xf32>
    %149 = vector.broadcast %16 : vector<1x256xf32> to vector<16x256xf32>
    %150 = arith.mulf %148, %149 : vector<16x256xf32>
    %c240_i32_37 = arith.constant 240 : i32
    %151 = tpu.dynamic_rotate %147 by %c240_i32_37 dim 1 : vector<16x256xf32>, i32 -> vector<16x256xf32>
    %152 = vector.broadcast %17 : vector<1x256xf32> to vector<16x256xf32>
    %153 = arith.mulf %151, %152 : vector<16x256xf32>
    %154 = tpu.concatenate %150, %147, %153 in 0 : vector<16x256xf32>, vector<16x256xf32>, vector<16x256xf32> -> vector<48x256xf32>
    %c1_i32_38 = arith.constant 1 : i32
    %155 = tpu.dynamic_rotate %154 by %c1_i32_38 dim 1 : vector<48x256xf32>, i32 -> vector<48x256xf32>
    %156 = vector.broadcast %18 : vector<1x256xf32> to vector<48x256xf32>
    %157 = arith.mulf %155, %156 : vector<48x256xf32>
    %158 = arith.truncf %157 : vector<48x256xf32> to vector<48x256xbf16>
    %c255_i32_39 = arith.constant 255 : i32
    %159 = tpu.dynamic_rotate %154 by %c255_i32_39 dim 1 : vector<48x256xf32>, i32 -> vector<48x256xf32>
    %160 = vector.broadcast %19 : vector<1x256xf32> to vector<48x256xf32>
    %161 = arith.mulf %159, %160 : vector<48x256xf32>
    %162 = arith.truncf %161 : vector<48x256xf32> to vector<48x256xbf16>
    %163 = arith.truncf %154 : vector<48x256xf32> to vector<48x256xbf16>
    %164 = tpu.concatenate %158, %163, %162 in 0 : vector<48x256xbf16>, vector<48x256xbf16>, vector<48x256xbf16> -> vector<144x256xbf16>
    %c0_40 = arith.constant 0 : index
    %c0_41 = arith.constant 0 : index
    %165 = vector.load %arg6[%c0_40, %c0_41] : memref<16x144xbf16, #tpu.memory_space<vmem>>, vector<16x144xbf16>
    %cst_42 = arith.constant dense<0.000000e+00> : vector<16x256xf32>
    %166 = tpu.matmul %165, %164, %cst_42 {dimension_numbers = #tpu.dot_dimension_numbers<[1], [0], [0], [1], [0, 0, 1, 1], [], []>} : vector<16x144xbf16>, vector<144x256xbf16>, vector<16x256xf32> -> vector<16x256xf32>
    %167 = vector.broadcast %12 : vector<16x1xf32> to vector<16x256xf32>
    %168 = arith.addf %166, %167 : vector<16x256xf32>
    %169 = arith.addf %168, %64 : vector<16x256xf32>
    %cst_43 = arith.constant dense<0.000000e+00> : vector<16xf32>
    %170 = vector.multi_reduction <add>, %169, %cst_43 [1] : vector<16x256xf32> to vector<16xf32>
    %171 = vector.shape_cast %170 : vector<16xf32> to vector<16x1xf32>
    %cst_44 = arith.constant 2.560000e+02 : f32
    %172 = vector.broadcast %cst_44 : f32 to vector<16x1xf32>
    %173 = arith.divf %171, %172 : vector<16x1xf32>
    %174 = arith.mulf %169, %169 : vector<16x256xf32>
    %cst_45 = arith.constant dense<0.000000e+00> : vector<16xf32>
    %175 = vector.multi_reduction <add>, %174, %cst_45 [1] : vector<16x256xf32> to vector<16xf32>
    %176 = vector.shape_cast %175 : vector<16xf32> to vector<16x1xf32>
    %cst_46 = arith.constant 2.560000e+02 : f32
    %177 = vector.broadcast %cst_46 : f32 to vector<16x1xf32>
    %178 = arith.divf %176, %177 : vector<16x1xf32>
    %179 = arith.mulf %173, %173 : vector<16x1xf32>
    %180 = arith.subf %178, %179 : vector<16x1xf32>
    %cst_47 = arith.constant 0.000000e+00 : f32
    %181 = vector.broadcast %cst_47 : f32 to vector<16x1xf32>
    %182 = arith.maximumf %180, %181 : vector<16x1xf32>
    %183 = vector.broadcast %173 : vector<16x1xf32> to vector<16x256xf32>
    %184 = arith.subf %169, %183 : vector<16x256xf32>
    %cst_48 = arith.constant 9.99999974E-6 : f32
    %185 = vector.broadcast %cst_48 : f32 to vector<16x1xf32>
    %186 = arith.addf %182, %185 : vector<16x1xf32>
    %187 = math.rsqrt %186 : vector<16x1xf32>
    %188 = arith.mulf %187, %13 : vector<16x1xf32>
    %189 = vector.broadcast %188 : vector<16x1xf32> to vector<16x256xf32>
    %190 = arith.mulf %184, %189 : vector<16x256xf32>
    %191 = vector.broadcast %14 : vector<16x1xf32> to vector<16x256xf32>
    %192 = arith.addf %190, %191 : vector<16x256xf32>
    %cst_49 = arith.constant 0.000000e+00 : f32
    %193 = vector.broadcast %cst_49 : f32 to vector<16x256xf32>
    %194 = arith.cmpf ogt, %192, %193 : vector<16x256xf32>
    %cst_50 = arith.constant 0.000000e+00 : f32
    %195 = vector.broadcast %cst_50 : f32 to vector<16x256xf32>
    %196 = arith.minimumf %192, %195 : vector<16x256xf32>
    %197 = math.exp %196 : vector<16x256xf32>
    %cst_51 = arith.constant 1.000000e+00 : f32
    %198 = vector.broadcast %cst_51 : f32 to vector<16x256xf32>
    %199 = arith.subf %197, %198 : vector<16x256xf32>
    %200 = arith.select %194, %192, %199 : vector<16x256xi1>, vector<16x256xf32>
    %c0_52 = arith.constant 0 : index
    %c0_53 = arith.constant 0 : index
    %201 = vector.load %arg10[%c0_52, %c0_53] : memref<16x256xf32, #tpu.memory_space<vmem>>, vector<16x256xf32>
    tpu.vector_store %arg10[%c0_52, %c0_53], %200 {strides = array<i32>} : memref<16x256xf32, #tpu.memory_space<vmem>>, vector<16x256xf32>,
    %c0_54 = arith.constant 0 : index
    %c0_55 = arith.constant 0 : index
    %202 = vector.load %arg7[%c0_54, %c0_55] : memref<6x16xbf16, #tpu.memory_space<vmem>>, vector<6x16xbf16>
    %203 = arith.truncf %200 : vector<16x256xf32> to vector<16x256xbf16>
    %cst_56 = arith.constant dense<0.000000e+00> : vector<6x256xf32>
    %204 = tpu.matmul %202, %203, %cst_56 {dimension_numbers = #tpu.dot_dimension_numbers<[1], [0], [0], [1], [0, 0, 1, 1], [], []>} : vector<6x16xbf16>, vector<16x256xbf16>, vector<6x256xf32> -> vector<6x256xf32>
    %205 = vector.broadcast %5 : vector<6x1xf32> to vector<6x256xf32>
    %206 = arith.addf %204, %205 : vector<6x256xf32>
    %c0_57 = arith.constant 0 : index
    %c0_58 = arith.constant 0 : index
    %207 = vector.load %arg9[%c0_57, %c0_58] : memref<6x256xf32, #tpu.memory_space<vmem>>, vector<6x256xf32>
    tpu.vector_store %arg9[%c0_57, %c0_58], %206 {strides = array<i32>} : memref<6x256xf32, #tpu.memory_space<vmem>>, vector<6x256xf32>,
    return
  }
  func.func @transform_0(%arg0: i32) -> (i32, i32) {
    %c0_i32 = arith.constant 0 : i32
    %c0_i32_0 = arith.constant 0 : i32
    return %arg0, %c0_i32 : i32, i32
  }
  func.func @transform_1(%arg0: i32) -> (i32, i32) {
    %c0_i32 = arith.constant 0 : i32
    %c0_i32_0 = arith.constant 0 : i32
    return %arg0, %c0_i32 : i32, i32
  }
  func.func @transform_2(%arg0: i32) -> (i32, i32) {
    %c0_i32 = arith.constant 0 : i32
    %c0_i32_0 = arith.constant 0 : i32
    %c0_i32_1 = arith.constant 0 : i32
    return %c0_i32, %c0_i32_0 : i32, i32
  }
  func.func @transform_3(%arg0: i32) -> (i32, i32) {
    %c0_i32 = arith.constant 0 : i32
    %c0_i32_0 = arith.constant 0 : i32
    %c0_i32_1 = arith.constant 0 : i32
    return %c0_i32, %c0_i32_0 : i32, i32
  }
  func.func @transform_4(%arg0: i32) -> (i32, i32) {
    %c0_i32 = arith.constant 0 : i32
    %c0_i32_0 = arith.constant 0 : i32
    %c0_i32_1 = arith.constant 0 : i32
    return %c0_i32, %c0_i32_0 : i32, i32
  }
  func.func @transform_5(%arg0: i32) -> (i32, i32) {
    %c0_i32 = arith.constant 0 : i32
    %c0_i32_0 = arith.constant 0 : i32
    %c0_i32_1 = arith.constant 0 : i32
    return %c0_i32, %c0_i32_0 : i32, i32
  }
  func.func @transform_6(%arg0: i32) -> (i32, i32) {
    %c0_i32 = arith.constant 0 : i32
    %c0_i32_0 = arith.constant 0 : i32
    %c0_i32_1 = arith.constant 0 : i32
    return %c0_i32, %c0_i32_0 : i32, i32
  }
  func.func @transform_7(%arg0: i32) -> (i32, i32) {
    %c0_i32 = arith.constant 0 : i32
    %c0_i32_0 = arith.constant 0 : i32
    %c0_i32_1 = arith.constant 0 : i32
    return %c0_i32, %c0_i32_0 : i32, i32
  }
  func.func @transform_8(%arg0: i32) -> (i32, i32) {
    %c0_i32 = arith.constant 0 : i32
    %c0_i32_0 = arith.constant 0 : i32
    return %arg0, %c0_i32 : i32, i32
  }
  func.func @transform_9(%arg0: i32) -> (i32, i32) {
    %c0_i32 = arith.constant 0 : i32
    %c0_i32_0 = arith.constant 0 : i32
    return %arg0, %c0_i32 : i32, i32
  }
}

</mosaic_0001>

<bundles_post_ra>
// kernel: tpu_custom_call.1
= control target key start
LH: loop header
LB: loop body
LE: loop exit
PB: predicated region body
PF: predicated region fallthrough
CT: control target
= control target key end

     0   :  { %15 = vsyncpa [#allocation3], 0  ;;  %v1412_v2 = vmov 0   ;;  %s2255_s0 = inlined_call_operand.vmem [shape: f32[16,256], index: 0, kind: input, shape index: {}]   ;;  %s2256_s1 = inlined_call_operand.vmem [shape: f32[2,256], index: 1, kind: input, shape index: {}]   ;;  %s2257_s2 = inlined_call_operand.vmem [shape: f32[88,9], index: 2, kind: input, shape index: {}]   ;;  %s2258_s3 = inlined_call_operand.vmem [shape: bf16[16,48], index: 3, kind: input, shape index: {}]   ;;  %s2259_s4 = inlined_call_operand.vmem [shape: bf16[16,144], index: 4, kind: input, shape index: {}]   ;;  %s2260_s5 = inlined_call_operand.vmem [shape: bf16[16,144], index: 5, kind: input, shape index: {}]   ;;  %s2261_s6 = inlined_call_operand.vmem [shape: bf16[6,16], index: 6, kind: input, shape index: {}]   ;;  %s2262_s7 = inlined_call_operand.vmem [shape: f32[4,256], index: 7, kind: input, shape index: {}]   ;;  %s2263_s8 = inlined_call_operand.hbm [shape: f32[6,256], index: 8, kind: output, shape index: {0}]   ;;  %s2264_s9 = inlined_call_operand.hbm [shape: f32[16,256], index: 9, kind: output, shape index: {1}]  }
   0x1   :  { %v42_v0 = vld [vmem:[%s2257_s2 + $0x40] sm:$0xff]  ;;  %1283 = vset.pattern.permute.xlu0 %v1412_v2  ;;  %v1491_v3 = vld [vmem:[%s2255_s0 + $0x8] sm:$0xff]  ;;  %v1496_v4 = vld [vmem:[%s2255_s0 + $0x10] sm:$0xff]  ;;  %374 = vmatprep.mubr.bf16.mxu0 %v1412_v2 }
   0x2   :  { %v1485_v1 = vld [vmem:[%s2255_s0] sm:$0xff]  ;;  %v1501_v5 = vld [vmem:[%s2255_s0 + $0x18] sm:$0xff]  ;;  %72 = vperm.xlu0 %1283, %v42_v0   ;;  %v43_v6 = vld [vmem:[%s2257_s2 + $0x48] sm:$0xff]  ;;  %v153_v9 = vmul.f32 %v1496_v4, %v1496_v4 }
   0x3   :  { %v122_v7 = vadd.f32 %v1491_v3, %v1485_v1  ;;  %v131_v8 = vadd.f32 %v1501_v5, %v1496_v4  ;;  %v154_v10 = vmul.f32 %v1501_v5, %v1501_v5 }
   0x5   :  { %123 = vadd.xlane.f32.xlu1 %v122_v7 }
   0x6   :  { %16 = vsyncpa [#allocation5], 0  ;;  %77 = vperm.xlu0 %1283, %v43_v6   ;;  %v168_v11 = vadd.f32 %v154_v10, %v153_v9  ;;  %v147_v12 = vmul.f32 %v1485_v1, %v1485_v1  ;;  %v148_v13 = vmul.f32 %v1491_v3, %v1491_v3  ;;  %v1413_v15 = vmov 1   ;;  %v50_v20 = vld [vmem:[%s2256_s1] sm:$0xf]  ;;  %s1417_s18 = smov 112  }
   0x7   :  { %1284 = vset.pattern.permute.xlu1 %v1413_v15  ;;  %v52_v16 = vlaneseq  ;;  %v1414_v32 = vmov 0.0   ;;  %v34_v0 = vld [vmem:[%s2257_s2] sm:$0xff]  ;;  %vm338_vm8 = vcmask 392192   ;;  %s1418_s19 = smov 1   ;;  %vm715_vm15 = vcmask 130048   ;;  %s1426_s12 = smov [#allocation4]  }
   0x8   :  { %v159_v14 = vadd.f32 %v148_v13, %v147_v12  ;;  %v37_v13 = vld [vmem:[%s2257_s2 + $0x18] sm:$0xff]  ;;  %s1222_s13 = sshll.u32 %s1426_s12, 4  ;;  %s1223_s13 = int_to_ptr.vmem [resolvable:$true] %s1222_s13 }
   0x9   :  { %132 = vadd.xlane.f32.xlu1 %v131_v8  ;;  %v1522_v17 = vshrl.u32 %v52_v16, 7  ;;  %v35_v8 = vld [vmem:[%s2257_s2 + $0x8] sm:$0xff]  ;;  %s1364_s14 = scalar_lea.vmem %s1223_s13, 512  ;;  %p1369_p1 = scmp.lt.s32.totalorder %s1223_s13, %s1223_s13 }
   0xa   :  { %1285 = vset.pattern.permute.xlu0 %v1413_v15  ;;  %p1365_p0 = scmp.ne.s32.totalorder %s1223_s13, %s1364_s14  ;;  %p1370_p2 = scmp.lt.s32.totalorder %s1364_s14, %s1364_s14 }
   0xb   :  { %v1525_v18 = vsub.s32 0, %v1522_v17  ;;  %v1528_v19 = vsub.s32 2, %v1522_v17  ;;  %v1534_v21 = vsub.s32 1, %v1522_v17  ;;  %v1537_v22 = vsub.s32 3, %v1522_v17 }
   0xc   :  { %p1371_p3 = por %p1370_p2, %p1369_p1 }
   0xd   :  { %169 = vadd.xlane.f32.xlu1 %v168_v11  ;;  %v55_v23 = vrot.slane %v50_v20, %v1525_v18  ;;  %v59_v24 = vrot.slane %v50_v20, %v1528_v19  ;;  %v95_v25 = vrot.slane %v50_v20, %v1534_v21  ;;  %v99_v26 = vrot.slane %v50_v20, %v1537_v22 }
   0xe   :  { %p1372_p4 = pnand %p1371_p3, %p1365_p0 }
   0xf   :  { %v65_v27 = vrot.slane %v55_v23, %v1525_v18  ;;  %v69_v28 = vrot.slane %v59_v24, %v1525_v18  ;;  %v105_v30 = vrot.slane %v95_v25, %v1534_v21  ;;  %v109_v31 = vrot.slane %v99_v26, %v1534_v21 }
  0x25   :  { %160 = vadd.xlane.f32.xlu0 %v159_v14  ;;  %v36_v14 = vld [vmem:[%s2257_s2 + $0x10] sm:$0xff] }
  0x81   :  { %v73_v29 = vpop.permute.xlu0 %72 }
  0x82   :  { %vm80_vm0 = vcmp.le.f32.partialorder %v65_v27, %v73_v29  ;;  %vm81_vm1 = vcmp.le.f32.partialorder %v69_v28, %v73_v29  ;;  %vm110_vm2 = vcmp.le.f32.partialorder %v105_v30, %v73_v29  ;;  %vm111_vm3 = vcmp.le.f32.partialorder %v109_v31, %v73_v29 }
  0x83   :  { %v1547_v33 = vsel %vm80_vm0, 1.0, %v1414_v32  ;;  %v1549_v34 = vsel %vm81_vm1, 1.0, %v1414_v32  ;;  %v1567_v44 = vsel %vm110_vm2, 1.0, %v1414_v32  ;;  %v1569_v45 = vsel %vm111_vm3, 1.0, %v1414_v32 }
  0x84   :  { %v125_v35 = vadd.f32 %v1549_v34, %v1547_v33  ;;  %v134_v47 = vadd.f32 %v1569_v45, %v1567_v44  ;;  %v149_v49 = vmul.f32 %v1547_v33, %v1547_v33  ;;  %v150_v50 = vmul.f32 %v1549_v34, %v1549_v34 }
  0x85   :  { %v78_v36 = vpop.permute.xlu0 %77  ;;  %v155_v55 = vmul.f32 %v1567_v44, %v1567_v44  ;;  %v156_v56 = vmul.f32 %v1569_v45, %v1569_v45 }
  0x86   :  { %vm112_vm4 = vcmp.le.f32.partialorder %v105_v30, %v78_v36  ;;  %vm113_vm5 = vcmp.le.f32.partialorder %v109_v31, %v78_v36  ;;  %126 = vadd.xlane.f32.xlu1 %v125_v35  ;;  %vm82_vm6 = vcmp.le.f32.partialorder %v65_v27, %v78_v36  ;;  %vm83_vm7 = vcmp.le.f32.partialorder %v69_v28, %v78_v36 }
  0x87   :  { %v1553_v37 = vsel %vm82_vm6, 1.0, %v1414_v32  ;;  %v1555_v38 = vsel %vm83_vm7, 1.0, %v1414_v32  ;;  %v1557_v39 = vsel %vm112_vm4, 1.0, %v1414_v32  ;;  %v1559_v40 = vsel %vm113_vm5, 1.0, %v1414_v32 }
  0x88   :  { %v128_v41 = vadd.f32 %v1555_v38, %v1553_v37  ;;  %v157_v42 = vmul.f32 %v1557_v39, %v1557_v39  ;;  %v158_v43 = vmul.f32 %v1559_v40, %v1559_v40  ;;  %v137_v48 = vadd.f32 %v1559_v40, %v1557_v39 }
  0x89   :  { %v162_v51 = vadd.f32 %v150_v50, %v149_v49  ;;  %v151_v52 = vmul.f32 %v1553_v37, %v1553_v37  ;;  %v152_v53 = vmul.f32 %v1555_v38, %v1555_v38  ;;  %v171_v58 = vadd.f32 %v156_v56, %v155_v55 }
  0x8a   :  { %129 = vadd.xlane.f32.xlu1 %v128_v41  ;;  %v174_v46 = vadd.f32 %v158_v43, %v157_v42 }
  0x8b   :  { %v165_v54 = vadd.f32 %v152_v53, %v151_v52 }
  0x8c   :  { %175 = vadd.xlane.f32.xlu0 %v174_v46 }
  0x8e   :  { %135 = vadd.xlane.f32.xlu1 %v134_v47 }
  0x92   :  { %138 = vadd.xlane.f32.xlu1 %v137_v48  ;;  %v124_v57 = vpop.xlane.xlu1 %123 }
  0x93   :  { %v1594_v6 = vmul.f32 0.00390625, %v124_v57 }
  0x95   :  { %v183_v9 = vmul.f32 %v1594_v6, %v1594_v6 }
  0x96   :  { %163 = vadd.xlane.f32.xlu1 %v162_v51  ;;  %v133_v59 = vpop.xlane.xlu1 %132 }
  0x97   :  { %v1587_v60 = vmul.f32 0.00390625, %v133_v59 }
  0x99   :  { %v186_v62 = vmul.f32 %v1587_v60, %v1587_v60 }
  0x9a   :  { %166 = vadd.xlane.f32.xlu1 %v165_v54  ;;  %v170_v61 = vpop.xlane.xlu1 %169 }
  0x9b   :  { %v180_v63 = vmul.f32 0.00390625, %v170_v61 }
  0x9d   :  { %v192_v7 = vsub.f32 %v180_v63, %v186_v62 }
  0x9e   :  { %172 = vadd.xlane.f32.xlu1 %v171_v58 }
  0x9f   :  { %v198_v11 = vmax.f32 %v192_v7, 0.0 }
  0xa1   :  { %v216_v23 = vadd.f32 1e-05, %v198_v11 }
  0xa2   :  { %285 = vperm.xlu0 %1285, %v36_v14  }
  0xa3   :  { %1314 = vrsqrt.f32 %v216_v23 }
  0xa6   :  { %1287 = vset.pattern.permute.xlu0 %v1412_v2 }
  0xad   :  { %v1315_v26 = vpop.eup %1314 }
  0xae   :  { %v228_v29 = vmul.f32 %v1315_v26, %v37_v13 }
  0xaf   :  { %275 = vperm.xlu1 %1284, %v34_v0  }
  0xb2   :  { %v161_v10 = vpop.xlane.xlu0 %160 }
  0xb3   :  { %v177_v12 = vmul.f32 0.00390625, %v161_v10  ;;  %280 = vperm.xlu1 %1284, %v35_v8  }
  0xb5   :  { %v189_v20 = vsub.f32 %v177_v12, %v183_v9 }
  0xb7   :  { %v195_v24 = vmax.f32 %v189_v20, 0.0  ;;  %290 = vperm.xlu1 %1284, %v37_v13  }
  0xb9   :  { %v213_v25 = vadd.f32 1e-05, %v195_v24 }
  0xbb   :  { %1316 = vrsqrt.f32 %v213_v25  ;;  %1286 = vset.pattern.permute.xlu1 %v1412_v2 }
  0xc5   :  { %v1317_v27 = vpop.eup %1316 }
  0xc6   :  { %v225_v28 = vmul.f32 %v1317_v27, %v34_v0  ;;  %v39_v27 = vld [vmem:[%s2257_s2 + $0x28] sm:$0xff] }
  0xc8   :  { %233 = vperm.xlu1 %1286, %v225_v28   ;;  %v38_v28 = vld [vmem:[%s2257_s2 + $0x20] sm:$0xff] }
  0xcc   :  { %248 = vperm.xlu1 %1286, %v228_v29  }
 0x113   :  { %v127_v30 = vpop.xlane.xlu1 %126 }
 0x114   :  { %v1609_v36 = vmul.f32 0.00390625, %v127_v30 }
 0x116   :  { %v184_v49 = vmul.f32 %v1609_v36, %v1609_v36 }
 0x117   :  { %v130_v31 = vpop.xlane.xlu1 %129 }
 0x118   :  { %v1615_v47 = vmul.f32 0.00390625, %v130_v31 }
 0x119   :  { %v176_v42 = vpop.xlane.xlu0 %175 }
 0x11a   :  { %v182_v48 = vmul.f32 0.00390625, %v176_v42  ;;  %v185_v56 = vmul.f32 %v1615_v47, %v1615_v47 }
 0x11b   :  { %v136_v32 = vpop.xlane.xlu1 %135 }
 0x11c   :  { %v1619_v54 = vmul.f32 0.00390625, %v136_v32 }
 0x11e   :  { %v187_v0 = vmul.f32 %v1619_v54, %v1619_v54 }
 0x11f   :  { %v139_v35 = vpop.xlane.xlu1 %138 }
 0x120   :  { %v1611_v41 = vmul.f32 0.00390625, %v139_v35 }
 0x122   :  { %v188_v43 = vmul.f32 %v1611_v41, %v1611_v41 }
 0x123   :  { %v164_v46 = vpop.xlane.xlu1 %163 }
 0x124   :  { %v178_v50 = vmul.f32 0.00390625, %v164_v46  ;;  %v194_v51 = vsub.f32 %v182_v48, %v188_v43  ;;  %v286_v43 = vpop.permute.xlu0 %285  ;;  %v201_v48 = vsub.f32 %v1485_v1, %v1594_v6  ;;  %v208_v1 = vsub.f32 %v1501_v5, %v1587_v60 }
 0x126   :  { %v190_v52 = vsub.f32 %v178_v50, %v184_v49  ;;  %v200_v58 = vmax.f32 %v194_v51, 0.0  ;;  %v202_v49 = vsub.f32 %v1491_v3, %v1594_v6  ;;  %v205_v3 = vsub.f32 %v1553_v37, %v1615_v47 }
 0x127   :  { %v167_v53 = vpop.xlane.xlu1 %166  ;;  %v206_v6 = vsub.f32 %v1555_v38, %v1615_v47 }
 0x128   :  { %v196_v55 = vmax.f32 %v190_v52, 0.0  ;;  %v179_v57 = vmul.f32 0.00390625, %v167_v53  ;;  %v218_v9 = vadd.f32 1e-05, %v200_v58  ;;  %v203_v52 = vsub.f32 %v1547_v33, %v1609_v36 }
 0x129   :  { %v204_v53 = vsub.f32 %v1549_v34, %v1609_v36  ;;  %v207_v58 = vsub.f32 %v1496_v4, %v1587_v60 }
 0x12a   :  { %v214_v59 = vadd.f32 1e-05, %v196_v55  ;;  %v191_v61 = vsub.f32 %v179_v57, %v185_v56 }
 0x12b   :  { %v173_v62 = vpop.xlane.xlu1 %172 }
 0x12c   :  { %1318 = vrsqrt.f32 %v214_v59  ;;  %v197_v63 = vmax.f32 %v191_v61, 0.0  ;;  %v181_v7 = vmul.f32 0.00390625, %v173_v62 }
 0x12e   :  { %v215_v10 = vadd.f32 1e-05, %v197_v63  ;;  %v193_v11 = vsub.f32 %v181_v7, %v187_v0 }
 0x12f   :  { %v276_v32 = vpop.permute.xlu1 %275 }
 0x130   :  { %1320 = vrsqrt.f32 %v215_v10  ;;  %v199_v12 = vmax.f32 %v193_v11, 0.0 }
 0x131   :  { %1322 = vrsqrt.f32 %v218_v9 }
 0x132   :  { %v217_v13 = vadd.f32 1e-05, %v199_v12 }
 0x133   :  { %v281_v35 = vpop.permute.xlu1 %280 }
 0x134   :  { %1324 = vrsqrt.f32 %v217_v13 }
 0x136   :  { %v1319_v20 = vpop.eup %1318 }
 0x137   :  { %v226_v23 = vmul.f32 %v1319_v20, %v35_v8  ;;  %v1634_v8 = vld [vmem:[%s2257_s2 + $0x30] sm:$0xff]  ;;  %v291_v42 = vpop.permute.xlu1 %290  ;;  %v211_v20 = vsub.f32 %v1557_v39, %v1611_v41 }
 0x139   :  { %238 = vperm.xlu0 %1287, %v226_v23   ;;  %v212_v23 = vsub.f32 %v1559_v40, %v1611_v41  ;;  %v1307_v40 = vld [vmem:[%s2258_s3] sm:$0xff]   ;;  %s1416_s3 = smov 16  }
 0x13a   :  { %v1321_v24 = vpop.eup %1320 }
 0x13b   :  { %v227_v25 = vmul.f32 %v1321_v24, %v36_v14  ;;  %v1323_v26 = vpop.eup %1322  ;;  %v1643_v14 = vld [vmem:[%s2257_s2 + $0x38] sm:$0xff]  ;;  %v209_v24 = vsub.f32 %v1567_v44, %v1619_v54 }
 0x13c   :  { %v230_v30 = vmul.f32 %v1323_v26, %v39_v27 }
 0x13d   :  { %243 = vperm.xlu0 %1287, %v227_v25   ;;  %v210_v25 = vsub.f32 %v1569_v45, %v1619_v54 }
 0x13e   :  { %v1325_v29 = vpop.eup %1324 }
 0x13f   :  { %v229_v31 = vmul.f32 %v1325_v29, %v38_v28 }
 0x141   :  { %258 = vperm.xlu0 %1287, %v230_v30   ;;  %253 = vperm.xlu1 %1286, %v229_v31  }
 0x145   :  { %325 = vperm.xlu0 %1287, %v1634_v8   ;;  %1288 = vset.pattern.permute.xlu1 %v1413_v15 }
 0x146   :  { %295 = vperm.xlu1 %1288, %v38_v28  }
 0x147   :  { %v234_v46 = vpop.permute.xlu1 %233 }
 0x148   :  { %v261_v50 = vmul.f32 %v234_v46, %v201_v48  ;;  %v262_v51 = vmul.f32 %v234_v46, %v202_v49 }
 0x149   :  { %1291 = vset.pattern.permute.xlu0 %v1413_v15 }
 0x14a   :  { %300 = vperm.xlu1 %1288, %v39_v27   ;;  %v304_v33 = vadd.f32 %v276_v32, %v262_v51  ;;  %v303_v61 = vadd.f32 %v276_v32, %v261_v50 }
 0x14b   :  { %v249_v55 = vpop.permute.xlu1 %248 }
 0x14c   :  { %v267_v36 = vmul.f32 %v249_v55, %v207_v58  ;;  %v268_v62 = vmul.f32 %v249_v55, %v208_v1 }
 0x14e   :  { %1289 = vset.pattern.permute.xlu1 %v1412_v2  ;;  %v309_v5 = vadd.f32 %v291_v42, %v267_v36  ;;  %v310_v60 = vadd.f32 %v291_v42, %v268_v62 }
 0x14f   :  { %330 = vperm.xlu1 %1289, %v1643_v14  }
 0x153   :  { %1290 = vset.pattern.permute.xlu1 %v1413_v15 }
 0x1b8   :  { %v239_v15 = vpop.permute.xlu0 %238 }
 0x1b9   :  { %v263_v56 = vmul.f32 %v239_v15, %v203_v52  ;;  %v264_v57 = vmul.f32 %v239_v15, %v204_v53 }
 0x1bb   :  { %v306_v59 = vadd.f32 %v281_v35, %v264_v57  ;;  %v305_v34 = vadd.f32 %v281_v35, %v263_v56 }
 0x1bc   :  { %v244_v63 = vpop.permute.xlu0 %243 }
 0x1bd   :  { %v265_v0 = vmul.f32 %v244_v63, %v205_v3  ;;  %v266_v7 = vmul.f32 %v244_v63, %v206_v6  ;;  %v318_v9 = vpack.c.bf16 %v306_v59, %v304_v33  ;;  %v317_v4 = vpack.c.bf16 %v305_v34, %v303_v61 }
 0x1bf   :  { %v307_v10 = vadd.f32 %v286_v43, %v265_v0  ;;  %v308_v11 = vadd.f32 %v286_v43, %v266_v7  ;;  %342 = vmatprep.subr.bf16.mxu0 %v318_v9 }
 0x1c0   :  { %343 = vmatpush1.bf16.msra.mxu0 %v317_v4  ;;  %v254_v37 = vpop.permute.xlu1 %253  ;;  %v259_v47 = vpop.permute.xlu0 %258 }
 0x1c1   :  { %v320_v12 = vpack.c.bf16 %v310_v60, %v308_v11  ;;  %v319_v38 = vpack.c.bf16 %v309_v5, %v307_v10  ;;  %v271_v26 = vmul.f32 %v259_v47, %v211_v20  ;;  %v272_v27 = vmul.f32 %v259_v47, %v212_v23 }
 0x1c2   :  { %v269_v28 = vmul.f32 %v254_v37, %v209_v24  ;;  %v270_v29 = vmul.f32 %v254_v37, %v210_v25 }
 0x1c3   :  { %344 = vmatprep.subr.bf16.mxu0 %v320_v12 }
 0x1c4   :  { %345 = vmatpush1.bf16.msra.mxu0 %v319_v38  ;;  %v326_v44 = vpop.permute.xlu0 %325 }
 0x1c5   :  { %v296_v13 = vpop.permute.xlu1 %295 }
 0x1c6   :  { %v311_v31 = vadd.f32 %v296_v13, %v269_v28  ;;  %v312_v32 = vadd.f32 %v296_v13, %v270_v29  ;;  %v1415_v13 = vmov 2  }
 0x1c9   :  { %v301_v30 = vpop.permute.xlu1 %300 }
 0x1ca   :  { %v313_v35 = vadd.f32 %v301_v30, %v271_v26  ;;  %v314_v42 = vadd.f32 %v301_v30, %v272_v27 }
 0x1cc   :  { %v322_v43 = vpack.c.bf16 %v314_v42, %v312_v32  ;;  %v321_v39 = vpack.c.bf16 %v313_v35, %v311_v31 }
 0x1ce   :  { %346 = vmatprep.subr.bf16.mxu0 %v322_v43  ;;  %v331_v41 = vpop.permute.xlu1 %330 }
 0x1cf   :  { %347 = vmatpush1.bf16.msra.mxu0 %v321_v39 }
 0x1d2   :  { %1246 = vmatmul.mubr.msk.bf16.vlgmr.msra.gmra.mrb[0].mxu0 %vm338_vm8, %v1307_v40 }
 0x2a5   :  { %v376_v45 = vpop.f32.mrb[0].mxu0 }
 0x2a6   :  { %v1674_v54 = vadd.f32 %v376_v45, %v326_v44  ;;  %v378_v46 = vpop.f32.mrb[1].mxu0 }
 0x2a7   :  { %v1676_v48 = vadd.f32 %v378_v46, %v326_v44  ;;  %v380_v49 = vpop.f32.mrb[2].mxu0 }
 0x2a8   :  { %v1678_v50 = vadd.f32 %v380_v49, %v331_v41  ;;  %v382_v51 = vpop.f32.mrb[3].mxu0  ;;  %v393_v15 = vmul.f32 %v1674_v54, %v1674_v54 }
 0x2a9   :  { %v1680_v52 = vadd.f32 %v382_v51, %v331_v41  ;;  %v385_v53 = vadd.f32 %v1676_v48, %v1674_v54  ;;  %v394_v55 = vmul.f32 %v1676_v48, %v1676_v48 }
 0x2aa   :  { %v395_v58 = vmul.f32 %v1678_v50, %v1678_v50 }
 0x2ab   :  { %386 = vadd.xlane.f32.xlu0 %v385_v53  ;;  %v388_v56 = vadd.f32 %v1680_v52, %v1678_v50  ;;  %v397_v57 = vadd.f32 %v394_v55, %v393_v15  ;;  %v396_v1 = vmul.f32 %v1680_v52, %v1680_v52 }
 0x2ad   :  { %389 = vadd.xlane.f32.xlu1 %v388_v56  ;;  %v400_v3 = vadd.f32 %v396_v1, %v395_v58 }
 0x2af   :  { %398 = vadd.xlane.f32.xlu0 %v397_v57 }
 0x2b3   :  { %401 = vadd.xlane.f32.xlu0 %v400_v3 }
 0x338   :  { %v387_v6 = vpop.xlane.xlu0 %386 }
 0x339   :  { %v391_v33 = vmul.f32 0.00390625, %v387_v6 }
 0x33a   :  { %v390_v59 = vpop.xlane.xlu1 %389 }
 0x33b   :  { %v392_v34 = vmul.f32 0.00390625, %v390_v59  ;;  %v405_v36 = vmul.f32 %v391_v33, %v391_v33  ;;  %v411_v23 = vsub.f32 %v1674_v54, %v391_v33  ;;  %v412_v24 = vsub.f32 %v1676_v48, %v391_v33 }
 0x33c   :  { %v399_v61 = vpop.xlane.xlu0 %398 }
 0x33d   :  { %v403_v62 = vmul.f32 0.00390625, %v399_v61  ;;  %v406_v4 = vmul.f32 %v392_v34, %v392_v34  ;;  %v413_v29 = vsub.f32 %v1678_v50, %v392_v34  ;;  %v414_v32 = vsub.f32 %v1680_v52, %v392_v34 }
 0x33f   :  { %v407_v63 = vsub.f32 %v403_v62, %v405_v36  ;;  %v1737_v62 = vld [vmem:[%s2262_s7] sm:$0xff]  ;;  %s1419_s7 = smov 127  }
 0x340   :  { %v402_v0 = vpop.xlane.xlu0 %401 }
 0x341   :  { %v409_v7 = vmax.f32 %v407_v63, 0.0  ;;  %v404_v9 = vmul.f32 0.00390625, %v402_v0  ;;  %v1740_v63 = vand.u32 127, %v52_v16  ;;  %v490_v0 = vrot.slane %v1737_v62, %v1525_v18 }
 0x343   :  { %v415_v10 = vadd.f32 1e-05, %v409_v7  ;;  %v408_v11 = vsub.f32 %v404_v9, %v406_v4  ;;  %v493_v7 = vsub.s32 4, %v1522_v17  ;;  %vm481_vm13 = vcmp.lt.s32.totalorder %v1740_v63, 16 }
 0x344   :  { %vm517_vm14 = vcmp.lt.s32.totalorder %v1740_v63, 112  ;;  %vm568_vm0 = vcmp.lt.s32.totalorder %v1740_v63, 1  ;;  %vm641_vm1 = vcmp.lt.s32.totalorder %v1740_v63, 127 }
 0x345   :  { %1326 = vrsqrt.f32 %v415_v10  ;;  %v410_v5 = vmax.f32 %v408_v11, 0.0  ;;  %v494_v4 = vrot.slane %v1737_v62, %v493_v7  ;;  %v1748_v10 = vrot.slane %v490_v0, %v1525_v18 }
 0x346   :  { %v584_v7 = vrot.slane %v1737_v62, %v1528_v19 }
 0x347   :  { %v416_v60 = vadd.f32 1e-05, %v410_v5  ;;  %v1753_v16 = vrot.slane %v494_v4, %v1525_v18 }
 0x349   :  { %1328 = vrsqrt.f32 %v416_v60 }
 0x34f   :  { %v1327_v37 = vpop.eup %1326 }
 0x350   :  { %v419_v12 = vmul.f32 %v1327_v37, %v1634_v8  ;;  %v525_v37 = vrot.slane %v1737_v62, %v1534_v21 }
 0x352   :  { %423 = vperm.xlu1 %1290, %v419_v12   ;;  %v528_v12 = vsub.s32 5, %v1522_v17 }
 0x353   :  { %v1329_v38 = vpop.eup %1328 }
 0x354   :  { %v420_v47 = vmul.f32 %v1329_v38, %v1643_v14 }
 0x356   :  { %1292 = vset.pattern.permute.xlu1 %v1415_v13  ;;  %428 = vperm.xlu0 %1291, %v420_v47  }
 0x357   :  { %436 = vperm.xlu1 %1292, %v1634_v8  }
 0x35b   :  { %440 = vperm.xlu1 %1292, %v1643_v14  }
 0x3d1   :  { %v424_v20 = vpop.permute.xlu1 %423 }
 0x3d2   :  { %v431_v25 = vmul.f32 %v424_v20, %v411_v23  ;;  %v432_v26 = vmul.f32 %v424_v20, %v412_v24  ;;  %v529_v20 = vrot.slane %v1737_v62, %v528_v12  ;;  %v1771_v23 = vrot.slane %v525_v37, %v1534_v21 }
 0x3d5   :  { %v429_v27 = vpop.permute.xlu0 %428 }
 0x3d6   :  { %v437_v28 = vpop.permute.xlu1 %436  ;;  %v433_v35 = vmul.f32 %v429_v27, %v413_v29  ;;  %v434_v40 = vmul.f32 %v429_v27, %v414_v32 }
 0x3d7   :  { %v443_v30 = vadd.f32 %v437_v28, %v431_v25  ;;  %v444_v31 = vadd.f32 %v437_v28, %v432_v26  ;;  %v1778_v26 = vrot.slane %v529_v20, %v1534_v21 }
 0x3d9   :  { %v451_v42 = vmin.f32 %v443_v30, 0.0  ;;  %v452_v43 = vmin.f32 %v444_v31, 0.0  ;;  %vm447_vm9 = vcmp.gt.f32.partialorder %v443_v30, 0.0  ;;  %vm448_vm10 = vcmp.gt.f32.partialorder %v444_v31, 0.0 }
 0x3da   :  { %v441_v39 = vpop.permute.xlu1 %440 }
 0x3db   :  { %v455_v44 = vmul.f32 1.442695, %v451_v42  ;;  %v457_v45 = vmul.f32 1.442695, %v452_v43  ;;  %v445_v41 = vadd.f32 %v441_v39, %v433_v35  ;;  %v446_v46 = vadd.f32 %v441_v39, %v434_v40 }
 0x3dd   :  { %1330 = vpow2.f32 %v455_v44  ;;  %v453_v49 = vmin.f32 %v445_v41, 0.0  ;;  %v454_v51 = vmin.f32 %v446_v46, 0.0  ;;  %vm449_vm11 = vcmp.gt.f32.partialorder %v445_v41, 0.0 }
 0x3de   :  { %1332 = vpow2.f32 %v457_v45  ;;  %vm450_vm12 = vcmp.gt.f32.partialorder %v446_v46, 0.0 }
 0x3df   :  { %v459_v53 = vmul.f32 1.442695, %v453_v49  ;;  %v461_v15 = vmul.f32 1.442695, %v454_v51 }
 0x3e1   :  { %1334 = vpow2.f32 %v459_v53  ;;  %v1310_v53 = vld [vmem:[%s2259_s4 + $0x4] ss:$8 sps:$4 sm:$0xff]  }
 0x3e2   :  { %1336 = vpow2.f32 %v461_v15  ;;  %1253 = vmatprep.mubr.msk.bf16.mxu1 %vm715_vm15, %v1310_v53  ;;  %v1420_v15 = vmov 3  }
 0x3e3   :  { %1293 = vset.pattern.permute.xlu0 %v1420_v15  ;;  %1294 = vset.pattern.permute.xlu1 %v1420_v15 }
 0x3e7   :  { %v1331_v55 = vpop.eup %1330 }
 0x3e8   :  { %v1333_v56 = vpop.eup %1332  ;;  %v1247_v57 = vadd.f32 -1.0, %v1331_v55 }
 0x3e9   :  { %v1248_v58 = vadd.f32 -1.0, %v1333_v56 }
 0x3ea   :  { %v1702_v1 = vsel %vm447_vm9, %v443_v30, %v1247_v57 }
 0x3eb   :  { %v1704_v3 = vsel %vm448_vm10, %v444_v31, %v1248_v58  ;;  %471 = vrot.lane.b32.xlu1 %v1702_v1, %s1416_s3  ;;  %v1335_v6 = vpop.eup %1334 }
 0x3ec   :  { %513 = vrot.lane.b32.xlu0 %v1704_v3, %s1417_s18  ;;  %v1249_v33 = vadd.f32 -1.0, %v1335_v6  ;;  %v1337_v59 = vpop.eup %1336 }
 0x3ed   :  { %v1250_v34 = vadd.f32 -1.0, %v1337_v59 }
 0x3ee   :  { %v1718_v61 = vsel %vm449_vm11, %v445_v41, %v1249_v33  ;;  %v587_v33 = vsub.s32 6, %v1522_v17 }
 0x3ef   :  { %475 = vrot.lane.b32.xlu1 %v1704_v3, %s1416_s3  ;;  %v1722_v36 = vsel %vm450_vm12, %v446_v46, %v1250_v34 }
 0x3f0   :  { %548 = vrot.lane.b32.xlu0 %v1702_v1, %s1418_s19  ;;  %v588_v0 = vrot.slane %v1737_v62, %v587_v33 }
 0x3f3   :  { %509 = vrot.lane.b32.xlu1 %v1702_v1, %s1417_s18 }
 0x3f4   :  { %560 = vrot.lane.b32.xlu0 %v1704_v3, %s1418_s19 }
 0x3f7   :  { %473 = vrot.lane.b32.xlu1 %v1718_v61, %s1416_s3 }
 0x3fb   :  { %477 = vrot.lane.b32.xlu1 %v1722_v36, %s1416_s3 }
 0x3ff   :  { %511 = vrot.lane.b32.xlu1 %v1718_v61, %s1417_s18 }
 0x403   :  { %515 = vrot.lane.b32.xlu1 %v1722_v36, %s1417_s18 }
 0x407   :  { %550 = vrot.lane.b32.xlu1 %v1718_v61, %s1418_s19 }
 0x40b   :  { %562 = vrot.lane.b32.xlu1 %v1722_v36, %s1418_s19 }
 0x45d   :  { %v472_v9 = vpop.permute.xlu1 %471 }
 0x45e   :  { %v514_v13 = vpop.permute.xlu0 %513 }
 0x461   :  { %v476_v11 = vpop.permute.xlu1 %475 }
 0x462   :  { %v484_v5 = vsel %vm481_vm13, %v476_v11, %v472_v9  ;;  %v482_v38 = vsel %vm481_vm13, %v472_v9, %v476_v11  ;;  %v549_v55 = vpop.permute.xlu0 %548 }
 0x463   :  { %v1756_v60 = vmul.f32 %v1748_v10, %v484_v5  ;;  %v1767_v18 = vmul.f32 %v1753_v16, %v482_v38  ;;  %v1866_v5 = vrot.slane %v588_v0, %v1528_v19  ;;  %v1873_v38 = vrot.slane %v584_v7, %v1528_v19 }
 0x465   :  { %544 = vrot.lane.b32.xlu0 %v1756_v60, %s1418_s19  ;;  %v510_v47 = vpop.permute.xlu1 %509 }
 0x466   :  { %v518_v24 = vsel %vm517_vm14, %v510_v47, %v514_v13  ;;  %v520_v28 = vsel %vm517_vm14, %v514_v13, %v510_v47  ;;  %v561_v56 = vpop.permute.xlu0 %560 }
 0x467   :  { %v1781_v27 = vmul.f32 %v1771_v23, %v518_v24  ;;  %v1792_v32 = vmul.f32 %v1778_v26, %v520_v28  ;;  %v571_v47 = vsel %vm568_vm0, %v549_v55, %v561_v56 }
 0x469   :  { %556 = vrot.lane.b32.xlu0 %v1767_v18, %s1418_s19  ;;  %v474_v25 = vpop.permute.xlu1 %473 }
 0x46d   :  { %552 = vrot.lane.b32.xlu0 %v1781_v27, %s1418_s19  ;;  %v478_v29 = vpop.permute.xlu1 %477 }
 0x46e   :  { %v483_v30 = vsel %vm481_vm13, %v474_v25, %v478_v29  ;;  %v485_v31 = vsel %vm481_vm13, %v478_v29, %v474_v25 }
 0x46f   :  { %v1795_v21 = vmul.f32 %v1748_v10, %v485_v31  ;;  %v1798_v35 = vmul.f32 %v1753_v16, %v483_v30 }
 0x471   :  { %564 = vrot.lane.b32.xlu0 %v1792_v32, %s1418_s19  ;;  %546 = vrot.lane.b32.xlu1 %v1795_v21, %s1418_s19  ;;  %v512_v42 = vpop.permute.xlu1 %511  ;;  %v691_v43 = vpack.c.bf16 %v1798_v35, %v1767_v18  ;;  %v690_v39 = vpack.c.bf16 %v1795_v21, %v1756_v60 }
 0x475   :  { %621 = vrot.lane.b32.xlu0 %v1702_v1, %s1419_s7  ;;  %558 = vrot.lane.b32.xlu1 %v1798_v35, %s1418_s19  ;;  %v516_v40 = vpop.permute.xlu1 %515 }
 0x476   :  { %v519_v44 = vsel %vm517_vm14, %v512_v42, %v516_v40  ;;  %v521_v45 = vsel %vm517_vm14, %v516_v40, %v512_v42  ;;  %v577_v40 = vsel %vm568_vm0, %v561_v56, %v549_v55 }
 0x477   :  { %v1817_v41 = vmul.f32 %v1771_v23, %v519_v44  ;;  %v1820_v46 = vmul.f32 %v1778_v26, %v521_v45  ;;  %v604_v44 = vmul.f32 %v1866_v5, %v571_v47  ;;  %v603_v33 = vmul.f32 %v1873_v38, %v577_v40 }
 0x479   :  { %617 = vrot.lane.b32.xlu0 %v1756_v60, %s1419_s7  ;;  %554 = vrot.lane.b32.xlu1 %v1817_v41, %s1418_s19  ;;  %v695_v49 = vpack.c.bf16 %v1820_v46, %v1792_v32  ;;  %v694_v51 = vpack.c.bf16 %v1817_v41, %v1781_v27  ;;  %v551_v58 = vpop.permute.xlu1 %550 }
 0x47d   :  { %629 = vrot.lane.b32.xlu0 %v1767_v18, %s1419_s7  ;;  %566 = vrot.lane.b32.xlu1 %v1820_v46, %s1418_s19  ;;  %v563_v59 = vpop.permute.xlu1 %562 }
 0x47e   :  { %v572_v11 = vsel %vm568_vm0, %v551_v58, %v563_v59  ;;  %v578_v24 = vsel %vm568_vm0, %v563_v59, %v551_v58 }
 0x47f   :  { %v606_v25 = vmul.f32 %v1866_v5, %v572_v11  ;;  %v605_v58 = vmul.f32 %v1873_v38, %v578_v24 }
 0x481   :  { %633 = vrot.lane.b32.xlu0 %v1704_v3, %s1419_s7  ;;  %623 = vrot.lane.b32.xlu1 %v1718_v61, %s1419_s7 }
 0x485   :  { %625 = vrot.lane.b32.xlu0 %v1781_v27, %s1419_s7  ;;  %635 = vrot.lane.b32.xlu1 %v1722_v36, %s1419_s7 }
 0x489   :  { %637 = vrot.lane.b32.xlu0 %v1792_v32, %s1419_s7  ;;  %619 = vrot.lane.b32.xlu1 %v1795_v21, %s1419_s7 }
 0x48d   :  { %631 = vrot.lane.b32.xlu1 %v1798_v35, %s1419_s7  ;;  %699 = vperm.xlu0 %1293, %v1634_v8   ;;  %v692_v35 = vpack.c.bf16 %v1718_v61, %v1702_v1 }
 0x491   :  { %627 = vrot.lane.b32.xlu1 %v1817_v41, %s1419_s7 }
 0x495   :  { %639 = vrot.lane.b32.xlu1 %v1820_v46, %s1419_s7 }
 0x499   :  { %703 = vperm.xlu1 %1294, %v1643_v14  }
 0x4d7   :  { %v545_v57 = vpop.permute.xlu0 %544 }
 0x4db   :  { %v557_v6 = vpop.permute.xlu0 %556 }
 0x4dc   :  { %v569_v37 = vsel %vm568_vm0, %v545_v57, %v557_v6  ;;  %v575_v12 = vsel %vm568_vm0, %v557_v6, %v545_v57  ;;  %v614_v6 = vpack.c.bf16 %v606_v25, %v604_v44  ;;  %v660_v25 = vsub.s32 7, %v1522_v17 }
 0x4dd   :  { %v599_v19 = vmul.f32 %v1873_v38, %v575_v12  ;;  %v600_v31 = vmul.f32 %v1866_v5, %v569_v37 }
 0x4df   :  { %v553_v34 = vpop.permute.xlu0 %552 }
 0x4e3   :  { %v565_v9 = vpop.permute.xlu0 %564  ;;  %v547_v4 = vpop.permute.xlu1 %546 }
 0x4e4   :  { %v573_v59 = vsel %vm568_vm0, %v553_v34, %v565_v9  ;;  %v579_v0 = vsel %vm568_vm0, %v565_v9, %v553_v34 }
 0x4e5   :  { %v607_v11 = vmul.f32 %v1873_v38, %v579_v0  ;;  %v608_v37 = vmul.f32 %v1866_v5, %v573_v59 }
 0x4e7   :  { %v1877_v13 = vpop.permute.xlu0 %621  ;;  %v559_v20 = vpop.permute.xlu1 %558 }
 0x4e8   :  { %v570_v28 = vsel %vm568_vm0, %v547_v4, %v559_v20  ;;  %v576_v29 = vsel %vm568_vm0, %v559_v20, %v547_v4  ;;  %v613_v4 = vpack.c.bf16 %v605_v58, %v603_v33 }
 0x4e9   :  { %v601_v30 = vmul.f32 %v1873_v38, %v576_v29  ;;  %v602_v42 = vmul.f32 %v1866_v5, %v570_v28  ;;  %v657_v28 = vrot.slane %v1737_v62, %v1537_v22 }
 0x4eb   :  { %v618_v45 = vpop.permute.xlu0 %617  ;;  %v555_v53 = vpop.permute.xlu1 %554  ;;  %v612_v15 = vpack.c.bf16 %v602_v42, %v600_v31  ;;  %v611_v57 = vpack.c.bf16 %v601_v30, %v599_v19  ;;  %v661_v30 = vrot.slane %v1737_v62, %v660_v25  ;;  %v693_v31 = vpack.c.bf16 %v1722_v36, %v1704_v3 }
 0x4ec   :  { %v1921_v17 = vrot.slane %v657_v28, %v1537_v22 }
 0x4ed   :  { %719 = vmatprep.subr.bf16.mxu1 %v612_v15  ;;  %v1924_v18 = vrot.slane %v661_v30, %v1537_v22 }
 0x4ee   :  { %720 = vmatpush1.bf16.msra.mxu1 %v611_v57 }
 0x4ef   :  { %721 = vmatprep.subr.bf16.mxu1 %v614_v6  ;;  %v567_v55 = vpop.permute.xlu1 %566  ;;  %v630_v12 = vpop.permute.xlu0 %629 }
 0x4f0   :  { %v574_v56 = vsel %vm568_vm0, %v555_v53, %v567_v55  ;;  %v580_v7 = vsel %vm568_vm0, %v567_v55, %v555_v53  ;;  %v642_v62 = vsel %vm641_vm1, %v618_v45, %v630_v12  ;;  %v648_v3 = vsel %vm641_vm1, %v630_v12, %v618_v45 }
 0x4f1   :  { %v609_v47 = vmul.f32 %v1873_v38, %v580_v7  ;;  %v610_v20 = vmul.f32 %v1866_v5, %v574_v56  ;;  %v672_v21 = vmul.f32 %v1921_v17, %v642_v62 }
 0x4f2   :  { %722 = vmatpush1.bf16.msra.mxu1 %v613_v4 }
 0x4f3   :  { %v624_v34 = vpop.permute.xlu1 %623  ;;  %v616_v9 = vpack.c.bf16 %v610_v20, %v608_v37  ;;  %v615_v24 = vpack.c.bf16 %v609_v47, %v607_v11  ;;  %v634_v29 = vpop.permute.xlu0 %633  ;;  %v1308_v47 = vld [vmem:[%s2259_s4] ss:$8 sps:$4 sm:$0xff]  }
 0x4f4   :  { %v650_v1 = vsel %vm641_vm1, %v634_v29, %v1877_v13 }
 0x4f5   :  { %723 = vmatprep.subr.bf16.mxu1 %v616_v9  ;;  %v677_v45 = vmul.f32 %v1924_v18, %v650_v1  ;;  %v1422_v1 = vmov 4  }
 0x4f6   :  { %724 = vmatpush1.bf16.msra.mxu1 %v615_v24  ;;  %1295 = vset.pattern.permute.xlu0 %v1422_v1 }
 0x4f7   :  { %725 = vmatprep.subr.bf16.mxu1 %v691_v43  ;;  %v636_v19 = vpop.permute.xlu1 %635  ;;  %v626_v36 = vpop.permute.xlu0 %625  ;;  %v673_v43 = vmul.f32 %v1924_v18, %v648_v3 }
 0x4f8   :  { %v651_v60 = vsel %vm641_vm1, %v636_v19, %v624_v34  ;;  %v645_v40 = vsel %vm641_vm1, %v624_v34, %v636_v19 }
 0x4f9   :  { %v679_v44 = vmul.f32 %v1924_v18, %v651_v60  ;;  %v678_v6 = vmul.f32 %v1921_v17, %v645_v40 }
 0x4fa   :  { %726 = vmatpush1.bf16.msra.mxu1 %v690_v39 }
 0x4fb   :  { %727 = vmatprep.subr.bf16.mxu1 %v693_v31  ;;  %v620_v42 = vpop.permute.xlu1 %619  ;;  %v638_v53 = vpop.permute.xlu0 %637  ;;  %v687_v33 = vpack.c.bf16 %v679_v44, %v677_v45 }
 0x4fc   :  { %v646_v27 = vsel %vm641_vm1, %v626_v36, %v638_v53  ;;  %v652_v41 = vsel %vm641_vm1, %v638_v53, %v626_v36 }
 0x4fd   :  { %v680_v56 = vmul.f32 %v1921_v17, %v646_v27  ;;  %v681_v7 = vmul.f32 %v1924_v18, %v652_v41 }
 0x4fe   :  { %728 = vmatpush1.bf16.msra.mxu1 %v692_v35 }
 0x4ff   :  { %729 = vmatprep.subr.bf16.mxu1 %v695_v49  ;;  %v632_v22 = vpop.permute.xlu1 %631  ;;  %v644_v49 = vsel %vm641_vm1, %v1877_v13, %v634_v29 }
 0x500   :  { %v643_v61 = vsel %vm641_vm1, %v620_v42, %v632_v22  ;;  %v649_v39 = vsel %vm641_vm1, %v632_v22, %v620_v42  ;;  %v676_v59 = vmul.f32 %v1921_v17, %v644_v49 }
 0x501   :  { %v674_v32 = vmul.f32 %v1921_v17, %v643_v61  ;;  %v675_v46 = vmul.f32 %v1924_v18, %v649_v39 }
 0x502   :  { %730 = vmatpush1.bf16.msra.mxu1 %v694_v51  ;;  %v686_v55 = vpack.c.bf16 %v678_v6, %v676_v59 }
 0x503   :  { %v628_v15 = vpop.permute.xlu1 %627  ;;  %v685_v57 = vpack.c.bf16 %v675_v46, %v673_v43  ;;  %v684_v58 = vpack.c.bf16 %v674_v32, %v672_v21  ;;  %v1421_v43 = vmov 5  }
 0x504   :  { %1296 = vset.pattern.permute.xlu1 %v1421_v43 }
 0x505   :  { %731 = vmatprep.subr.bf16.mxu1 %v685_v57 }
 0x506   :  { %732 = vmatpush1.bf16.msra.mxu1 %v684_v58 }
 0x507   :  { %733 = vmatprep.subr.bf16.mxu1 %v687_v33  ;;  %v640_v51 = vpop.permute.xlu1 %639 }
 0x508   :  { %v647_v13 = vsel %vm641_vm1, %v628_v15, %v640_v51  ;;  %v653_v0 = vsel %vm641_vm1, %v640_v51, %v628_v15 }
 0x509   :  { %v682_v4 = vmul.f32 %v1921_v17, %v647_v13  ;;  %v683_v11 = vmul.f32 %v1924_v18, %v653_v0 }
 0x50a   :  { %734 = vmatpush1.bf16.msra.mxu1 %v686_v55 }
 0x50b   :  { %v689_v37 = vpack.c.bf16 %v683_v11, %v681_v7  ;;  %v688_v12 = vpack.c.bf16 %v682_v4, %v680_v56 }
 0x50c   :  { %v700_v20 = vpop.permute.xlu0 %699 }
 0x50d   :  { %735 = vmatprep.subr.bf16.mxu1 %v689_v37 }
 0x50e   :  { %736 = vmatpush1.bf16.msra.mxu1 %v688_v12 }
 0x511   :  { %752 = vmatmul.mubr.bf16.vlgmr.msra.gmra.mrb[0].mxu1 %v1308_v47 }
 0x512   :  { %1196 = vmatprep.mubr.bf16.mxu1 %v1412_v2 }
 0x518   :  { %v704_v9 = vpop.permute.xlu1 %703 }
 0x5e4   :  { %v753_v34 = vpop.f32.mrb[0].mxu1 }
 0x5e5   :  { %v754_v24 = vadd.f32 %v753_v34, %v700_v20  ;;  %v755_v25 = vpop.f32.mrb[1].mxu1 }
 0x5e6   :  { %v756_v28 = vadd.f32 %v755_v25, %v700_v20  ;;  %v757_v29 = vpop.f32.mrb[2].mxu1 }
 0x5e7   :  { %v758_v19 = vadd.f32 %v757_v29, %v704_v9  ;;  %v759_v30 = vpop.f32.mrb[3].mxu1  ;;  %v770_v36 = vmul.f32 %v754_v24, %v754_v24 }
 0x5e8   :  { %v760_v31 = vadd.f32 %v759_v30, %v704_v9  ;;  %v762_v42 = vadd.f32 %v756_v28, %v754_v24  ;;  %v771_v60 = vmul.f32 %v756_v28, %v756_v28 }
 0x5e9   :  { %v772_v62 = vmul.f32 %v758_v19, %v758_v19 }
 0x5ea   :  { %763 = vadd.xlane.f32.xlu1 %v762_v42  ;;  %v765_v35 = vadd.f32 %v760_v31, %v758_v19  ;;  %v773_v3 = vmul.f32 %v760_v31, %v760_v31  ;;  %v774_v22 = vadd.f32 %v771_v60, %v770_v36 }
 0x5ec   :  { %766 = vadd.xlane.f32.xlu0 %v765_v35  ;;  %v777_v21 = vadd.f32 %v773_v3, %v772_v62 }
 0x5ee   :  { %778 = vadd.xlane.f32.xlu1 %v777_v21 }
 0x5f0   :  { %775 = vadd.xlane.f32.xlu0 %v774_v22 }
 0x5ff   :  { %813 = vperm.xlu1 %1296, %v1634_v8  }
 0x603   :  { %1297 = vset.pattern.permute.xlu1 %v1422_v1 }
 0x677   :  { %v764_v61 = vpop.xlane.xlu1 %763 }
 0x678   :  { %v768_v40 = vmul.f32 0.00390625, %v764_v61 }
 0x679   :  { %v767_v39 = vpop.xlane.xlu0 %766 }
 0x67a   :  { %v769_v44 = vmul.f32 0.00390625, %v767_v39  ;;  %v782_v57 = vmul.f32 %v768_v40, %v768_v40  ;;  %v788_v7 = vsub.f32 %v754_v24, %v768_v40  ;;  %v789_v4 = vsub.f32 %v756_v28, %v768_v40 }
 0x67b   :  { %v779_v32 = vpop.xlane.xlu1 %778 }
 0x67c   :  { %v783_v46 = vmul.f32 %v769_v44, %v769_v44  ;;  %v781_v49 = vmul.f32 0.00390625, %v779_v32  ;;  %v790_v11 = vsub.f32 %v758_v19, %v769_v44  ;;  %v791_v12 = vsub.f32 %v760_v31, %v769_v44 }
 0x67d   :  { %v776_v45 = vpop.xlane.xlu0 %775 }
 0x67e   :  { %v785_v53 = vsub.f32 %v781_v49, %v783_v46  ;;  %v780_v15 = vmul.f32 0.00390625, %v776_v45 }
 0x67f   :  { %v814_v55 = vpop.permute.xlu1 %813 }
 0x680   :  { %v787_v58 = vmax.f32 %v785_v53, 0.0  ;;  %v784_v6 = vsub.f32 %v780_v15, %v782_v57 }
 0x682   :  { %v793_v33 = vadd.f32 1e-05, %v787_v58  ;;  %v786_v59 = vmax.f32 %v784_v6, 0.0 }
 0x684   :  { %1338 = vrsqrt.f32 %v793_v33  ;;  %v792_v27 = vadd.f32 1e-05, %v786_v59 }
 0x686   :  { %1340 = vrsqrt.f32 %v792_v27 }
 0x68e   :  { %v1339_v41 = vpop.eup %1338 }
 0x68f   :  { %v797_v51 = vmul.f32 %v1339_v41, %v1643_v14 }
 0x690   :  { %v1341_v13 = vpop.eup %1340 }
 0x691   :  { %805 = vperm.xlu1 %1297, %v797_v51   ;;  %v796_v0 = vmul.f32 %v1341_v13, %v1634_v8 }
 0x693   :  { %800 = vperm.xlu0 %1295, %v796_v0  }
 0x695   :  { %1298 = vset.pattern.permute.xlu1 %v1421_v43 }
 0x696   :  { %817 = vperm.xlu1 %1298, %v1643_v14  }
 0x710   :  { %v806_v56 = vpop.permute.xlu1 %805 }
 0x711   :  { %v810_v34 = vmul.f32 %v806_v56, %v790_v11  ;;  %v811_v9 = vmul.f32 %v806_v56, %v791_v12 }
 0x712   :  { %v801_v37 = vpop.permute.xlu0 %800 }
 0x713   :  { %v808_v47 = vmul.f32 %v801_v37, %v788_v7  ;;  %v809_v20 = vmul.f32 %v801_v37, %v789_v4 }
 0x715   :  { %v820_v25 = vadd.f32 %v814_v55, %v808_v47  ;;  %v821_v29 = vadd.f32 %v814_v55, %v809_v20  ;;  %v818_v30 = vpop.permute.xlu1 %817 }
 0x716   :  { %v822_v42 = vadd.f32 %v818_v30, %v810_v34  ;;  %v823_v35 = vadd.f32 %v818_v30, %v811_v9  ;;  %v2113_v30 = vld [vmem:[%s2257_s2 + $0x38] sm:$0xff] }
 0x717   :  { %v828_v8 = vmin.f32 %v820_v25, 0.0  ;;  %v829_v62 = vmin.f32 %v821_v29, 0.0  ;;  %vm824_vm2 = vcmp.gt.f32.partialorder %v820_v25, 0.0  ;;  %vm825_vm3 = vcmp.gt.f32.partialorder %v821_v29, 0.0 }
 0x718   :  { %v830_v3 = vmin.f32 %v822_v42, 0.0  ;;  %v831_v24 = vmin.f32 %v823_v35, 0.0  ;;  %vm826_vm4 = vcmp.gt.f32.partialorder %v822_v42, 0.0  ;;  %vm827_vm5 = vcmp.gt.f32.partialorder %v823_v35, 0.0 }
 0x719   :  { %v832_v14 = vmul.f32 1.442695, %v828_v8  ;;  %v834_v36 = vmul.f32 1.442695, %v829_v62 }
 0x71a   :  { %v836_v28 = vmul.f32 1.442695, %v830_v3  ;;  %v838_v19 = vmul.f32 1.442695, %v831_v24 }
 0x71b   :  { %1342 = vpow2.f32 %v832_v14 }
 0x71c   :  { %1344 = vpow2.f32 %v834_v36 }
 0x71d   :  { %1346 = vpow2.f32 %v836_v28 }
 0x71e   :  { %1348 = vpow2.f32 %v838_v19 }
 0x725   :  { %v1343_v31 = vpop.eup %1342 }
 0x726   :  { %v1345_v60 = vpop.eup %1344  ;;  %v1254_v21 = vadd.f32 -1.0, %v1343_v31 }
 0x727   :  { %v1255_v43 = vadd.f32 -1.0, %v1345_v60  ;;  %v1347_v1 = vpop.eup %1346 }
 0x728   :  { %v1980_v22 = vsel %vm824_vm2, %v820_v25, %v1254_v21  ;;  %v1256_v61 = vadd.f32 -1.0, %v1347_v1  ;;  %v1349_v40 = vpop.eup %1348 }
 0x729   :  { %864 = vrot.lane.b32.xlu0 %v1980_v22, %s1417_s18  ;;  %848 = vrot.lane.b32.xlu1 %v1980_v22, %s1416_s3  ;;  %v1986_v39 = vsel %vm825_vm3, %v821_v29, %v1255_v43  ;;  %v1257_v44 = vadd.f32 -1.0, %v1349_v40  ;;  %v2105_v29 = vld [vmem:[%s2257_s2 + $0x30] sm:$0xff] }
 0x72a   :  { %v1992_v32 = vsel %vm826_vm4, %v822_v42, %v1256_v61 }
 0x72b   :  { %v1998_v46 = vsel %vm827_vm5, %v823_v35, %v1257_v44 }
 0x72d   :  { %868 = vrot.lane.b32.xlu0 %v1986_v39, %s1417_s18  ;;  %852 = vrot.lane.b32.xlu1 %v1986_v39, %s1416_s3 }
 0x731   :  { %884 = vrot.lane.b32.xlu0 %v1980_v22, %s1418_s19  ;;  %850 = vrot.lane.b32.xlu1 %v1992_v32, %s1416_s3 }
 0x735   :  { %896 = vrot.lane.b32.xlu0 %v1986_v39, %s1418_s19  ;;  %854 = vrot.lane.b32.xlu1 %v1998_v46, %s1416_s3 }
 0x739   :  { %866 = vrot.lane.b32.xlu1 %v1992_v32, %s1417_s18 }
 0x73d   :  { %870 = vrot.lane.b32.xlu1 %v1998_v46, %s1417_s18 }
 0x741   :  { %886 = vrot.lane.b32.xlu1 %v1992_v32, %s1418_s19 }
 0x745   :  { %898 = vrot.lane.b32.xlu1 %v1998_v46, %s1418_s19 }
 0x79b   :  { %v849_v49 = vpop.permute.xlu1 %848  ;;  %v865_v45 = vpop.permute.xlu0 %864 }
 0x79f   :  { %v853_v53 = vpop.permute.xlu1 %852  ;;  %v869_v6 = vpop.permute.xlu0 %868 }
 0x7a0   :  { %v858_v15 = vsel %vm481_vm13, %v853_v53, %v849_v49  ;;  %v856_v58 = vsel %vm481_vm13, %v849_v49, %v853_v53  ;;  %v872_v27 = vsel %vm517_vm14, %v865_v45, %v869_v6  ;;  %v874_v7 = vsel %vm517_vm14, %v869_v6, %v865_v45 }
 0x7a1   :  { %v2015_v57 = vmul.f32 %v858_v15, %v1748_v10  ;;  %v2022_v59 = vmul.f32 %v856_v58, %v1753_v16  ;;  %v2033_v0 = vmul.f32 %v872_v27, %v1771_v23  ;;  %v2052_v37 = vmul.f32 %v874_v7, %v1778_v26 }
 0x7a3   :  { %880 = vrot.lane.b32.xlu0 %v2015_v57, %s1418_s19  ;;  %v851_v33 = vpop.permute.xlu1 %850  ;;  %v885_v42 = vpop.permute.xlu0 %884 }
 0x7a7   :  { %892 = vrot.lane.b32.xlu0 %v2022_v59, %s1418_s19  ;;  %v855_v41 = vpop.permute.xlu1 %854  ;;  %v897_v8 = vpop.permute.xlu0 %896 }
 0x7a8   :  { %v857_v51 = vsel %vm481_vm13, %v851_v33, %v855_v41  ;;  %v859_v13 = vsel %vm481_vm13, %v855_v41, %v851_v33  ;;  %v906_v60 = vsel %vm568_vm0, %v885_v42, %v897_v8  ;;  %v912_v58 = vsel %vm568_vm0, %v897_v8, %v885_v42 }
 0x7a9   :  { %v2036_v55 = vmul.f32 %v859_v13, %v1748_v10  ;;  %v2039_v56 = vmul.f32 %v857_v51, %v1753_v16  ;;  %v921_v6 = vmul.f32 %v906_v60, %v1866_v5 }
 0x7ab   :  { %v988_v4 = vpack.c.bf16 %v2036_v55, %v2015_v57  ;;  %888 = vrot.lane.b32.xlu0 %v2033_v0, %s1418_s19  ;;  %882 = vrot.lane.b32.xlu1 %v2036_v55, %s1418_s19  ;;  %v867_v11 = vpop.permute.xlu1 %866  ;;  %v989_v10 = vpack.c.bf16 %v2039_v56, %v2022_v59 }
 0x7af   :  { %900 = vrot.lane.b32.xlu0 %v2052_v37, %s1418_s19  ;;  %894 = vrot.lane.b32.xlu1 %v2039_v56, %s1418_s19  ;;  %v871_v16 = vpop.permute.xlu1 %870 }
 0x7b0   :  { %v873_v12 = vsel %vm517_vm14, %v867_v11, %v871_v16  ;;  %v875_v47 = vsel %vm517_vm14, %v871_v16, %v867_v11  ;;  %v920_v11 = vmul.f32 %v912_v58, %v1873_v38 }
 0x7b1   :  { %v2063_v20 = vmul.f32 %v873_v12, %v1771_v23  ;;  %v2066_v34 = vmul.f32 %v875_v47, %v1778_v26  ;;  %v1311_v23 = vld [vmem:[%s2260_s5 + $0x4] ss:$8 sps:$4 sm:$0xff]   ;;  %v1423_v26 = vmov 6  }
 0x7b2   :  { %1260 = vmatprep.mubr.msk.bf16.mxu0 %vm715_vm15, %v1311_v23  ;;  %1299 = vset.pattern.permute.xlu0 %v1423_v26 }
 0x7b3   :  { %v992_v9 = vpack.c.bf16 %v2063_v20, %v2033_v0  ;;  %938 = vrot.lane.b32.xlu0 %v1980_v22, %s1419_s7  ;;  %890 = vrot.lane.b32.xlu1 %v2063_v20, %s1418_s19  ;;  %v993_v25 = vpack.c.bf16 %v2066_v34, %v2052_v37  ;;  %v887_v62 = vpop.permute.xlu1 %886 }
 0x7b4   :  { %1300 = vset.pattern.permute.xlu1 %v1423_v26 }
 0x7b7   :  { %934 = vrot.lane.b32.xlu0 %v2015_v57, %s1419_s7  ;;  %902 = vrot.lane.b32.xlu1 %v2066_v34, %s1418_s19  ;;  %v899_v3 = vpop.permute.xlu1 %898 }
 0x7b8   :  { %v907_v28 = vsel %vm568_vm0, %v887_v62, %v899_v3  ;;  %v913_v1 = vsel %vm568_vm0, %v899_v3, %v887_v62 }
 0x7b9   :  { %v923_v61 = vmul.f32 %v907_v28, %v1866_v5  ;;  %v922_v13 = vmul.f32 %v913_v1, %v1873_v38 }
 0x7bb   :  { %946 = vrot.lane.b32.xlu0 %v2022_v59, %s1419_s7  ;;  %940 = vrot.lane.b32.xlu1 %v1992_v32, %s1419_s7  ;;  %v931_v7 = vpack.c.bf16 %v923_v61, %v921_v6  ;;  %v930_v26 = vpack.c.bf16 %v922_v13, %v920_v11  ;;  %v990_v59 = vpack.c.bf16 %v1992_v32, %v1980_v22 }
 0x7bf   :  { %950 = vrot.lane.b32.xlu0 %v1986_v39, %s1419_s7  ;;  %952 = vrot.lane.b32.xlu1 %v1998_v46, %s1419_s7 }
 0x7c3   :  { %942 = vrot.lane.b32.xlu0 %v2033_v0, %s1419_s7  ;;  %936 = vrot.lane.b32.xlu1 %v2036_v55, %s1419_s7 }
 0x7c7   :  { %954 = vrot.lane.b32.xlu0 %v2052_v37, %s1419_s7  ;;  %948 = vrot.lane.b32.xlu1 %v2039_v56, %s1419_s7 }
 0x7cb   :  { %944 = vrot.lane.b32.xlu1 %v2063_v20, %s1419_s7  ;;  %997 = vperm.xlu0 %1299, %v2105_v29  }
 0x7cf   :  { %956 = vrot.lane.b32.xlu1 %v2066_v34, %s1419_s7 }
 0x7d3   :  { %1001 = vperm.xlu1 %1300, %v2113_v30  }
 0x815   :  { %v881_v35 = vpop.permute.xlu0 %880 }
 0x819   :  { %v893_v14 = vpop.permute.xlu0 %892 }
 0x81a   :  { %v904_v19 = vsel %vm568_vm0, %v881_v35, %v893_v14  ;;  %v910_v31 = vsel %vm568_vm0, %v893_v14, %v881_v35 }
 0x81b   :  { %v916_v49 = vmul.f32 %v910_v31, %v1873_v38  ;;  %v917_v45 = vmul.f32 %v904_v19, %v1866_v5 }
 0x81d   :  { %v889_v36 = vpop.permute.xlu0 %888  ;;  %v883_v24 = vpop.permute.xlu1 %882 }
 0x821   :  { %v901_v21 = vpop.permute.xlu0 %900  ;;  %v895_v43 = vpop.permute.xlu1 %894 }
 0x822   :  { %v905_v40 = vsel %vm568_vm0, %v883_v24, %v895_v43  ;;  %v911_v44 = vsel %vm568_vm0, %v895_v43, %v883_v24  ;;  %v908_v16 = vsel %vm568_vm0, %v889_v36, %v901_v21  ;;  %v914_v12 = vsel %vm568_vm0, %v901_v21, %v889_v36 }
 0x823   :  { %v918_v53 = vmul.f32 %v911_v44, %v1873_v38  ;;  %v919_v15 = vmul.f32 %v905_v40, %v1866_v5  ;;  %v924_v62 = vmul.f32 %v914_v12, %v1873_v38  ;;  %v925_v35 = vmul.f32 %v908_v16, %v1866_v5  ;;  %v1313_v12 = vld [vmem:[%s2260_s5] ss:$8 sps:$4 sm:$0xff]  }
 0x824   :  { %v991_v21 = vpack.c.bf16 %v1998_v46, %v1986_v39 }
 0x825   :  { %v928_v33 = vpack.c.bf16 %v918_v53, %v916_v49  ;;  %v939_v27 = vpop.permute.xlu0 %938  ;;  %v891_v41 = vpop.permute.xlu1 %890  ;;  %v929_v51 = vpack.c.bf16 %v919_v15, %v917_v45 }
 0x827   :  { %1016 = vmatprep.subr.bf16.mxu0 %v929_v51 }
 0x828   :  { %1017 = vmatpush1.bf16.msra.mxu0 %v928_v33 }
 0x829   :  { %v935_v47 = vpop.permute.xlu0 %934  ;;  %1018 = vmatprep.subr.bf16.mxu0 %v931_v7  ;;  %v903_v23 = vpop.permute.xlu1 %902 }
 0x82a   :  { %v909_v42 = vsel %vm568_vm0, %v891_v41, %v903_v23  ;;  %v915_v8 = vsel %vm568_vm0, %v903_v23, %v891_v41 }
 0x82b   :  { %v926_v3 = vmul.f32 %v915_v8, %v1873_v38  ;;  %v927_v14 = vmul.f32 %v909_v42, %v1866_v5 }
 0x82c   :  { %1019 = vmatpush1.bf16.msra.mxu0 %v930_v26 }
 0x82d   :  { %v932_v36 = vpack.c.bf16 %v926_v3, %v924_v62  ;;  %v947_v24 = vpop.permute.xlu0 %946  ;;  %v941_v28 = vpop.permute.xlu1 %940  ;;  %v933_v19 = vpack.c.bf16 %v927_v14, %v925_v35 }
 0x82e   :  { %v958_v38 = vsel %vm641_vm1, %v935_v47, %v947_v24  ;;  %v964_v43 = vsel %vm641_vm1, %v947_v24, %v935_v47 }
 0x82f   :  { %1020 = vmatprep.subr.bf16.mxu0 %v933_v19  ;;  %v970_v46 = vmul.f32 %v958_v38, %v1921_v17  ;;  %v971_v57 = vmul.f32 %v964_v43, %v1924_v18 }
 0x830   :  { %1021 = vmatpush1.bf16.msra.mxu0 %v932_v36 }
 0x831   :  { %v951_v31 = vpop.permute.xlu0 %950  ;;  %1022 = vmatprep.subr.bf16.mxu0 %v989_v10  ;;  %v953_v60 = vpop.permute.xlu1 %952 }
 0x832   :  { %v966_v10 = vsel %vm641_vm1, %v951_v31, %v939_v27  ;;  %v967_v39 = vsel %vm641_vm1, %v953_v60, %v941_v28  ;;  %v960_v22 = vsel %vm641_vm1, %v939_v27, %v951_v31  ;;  %v961_v32 = vsel %vm641_vm1, %v941_v28, %v953_v60 }
 0x833   :  { %v975_v61 = vmul.f32 %v966_v10, %v1924_v18  ;;  %v977_v40 = vmul.f32 %v967_v39, %v1924_v18  ;;  %v974_v53 = vmul.f32 %v960_v22, %v1921_v17  ;;  %v976_v15 = vmul.f32 %v961_v32, %v1921_v17 }
 0x834   :  { %1023 = vmatpush1.bf16.msra.mxu0 %v988_v4 }
 0x835   :  { %1024 = vmatprep.subr.bf16.mxu0 %v991_v21  ;;  %v937_v5 = vpop.permute.xlu1 %936  ;;  %v943_v56 = vpop.permute.xlu0 %942  ;;  %v985_v58 = vpack.c.bf16 %v977_v40, %v975_v61  ;;  %v984_v20 = vpack.c.bf16 %v976_v15, %v974_v53 }
 0x838   :  { %1025 = vmatpush1.bf16.msra.mxu0 %v990_v59 }
 0x839   :  { %1026 = vmatprep.subr.bf16.mxu0 %v993_v25  ;;  %v949_v55 = vpop.permute.xlu1 %948  ;;  %v955_v25 = vpop.permute.xlu0 %954 }
 0x83a   :  { %v959_v4 = vsel %vm641_vm1, %v937_v5, %v949_v55  ;;  %v965_v1 = vsel %vm641_vm1, %v949_v55, %v937_v5  ;;  %v962_v6 = vsel %vm641_vm1, %v943_v56, %v955_v25  ;;  %v968_v33 = vsel %vm641_vm1, %v955_v25, %v943_v56 }
 0x83b   :  { %v972_v37 = vmul.f32 %v959_v4, %v1921_v17  ;;  %v973_v34 = vmul.f32 %v965_v1, %v1924_v18  ;;  %v978_v41 = vmul.f32 %v962_v6, %v1921_v17  ;;  %v979_v51 = vmul.f32 %v968_v33, %v1924_v18 }
 0x83c   :  { %1027 = vmatpush1.bf16.msra.mxu0 %v992_v9 }
 0x83d   :  { %v982_v44 = vpack.c.bf16 %v972_v37, %v970_v46  ;;  %v945_v49 = vpop.permute.xlu1 %944  ;;  %v983_v45 = vpack.c.bf16 %v973_v34, %v971_v57 }
 0x83f   :  { %1028 = vmatprep.subr.bf16.mxu0 %v983_v45  ;;  %v44_v45 = vld [vmem:[%s2257_s2 + $0x50] sm:$0xff] }
 0x840   :  { %1029 = vmatpush1.bf16.msra.mxu0 %v982_v44 }
 0x841   :  { %1030 = vmatprep.subr.bf16.mxu0 %v985_v58  ;;  %v957_v0 = vpop.permute.xlu1 %956 }
 0x842   :  { %v963_v9 = vsel %vm641_vm1, %v945_v49, %v957_v0  ;;  %v969_v27 = vsel %vm641_vm1, %v957_v0, %v945_v49 }
 0x843   :  { %v980_v13 = vmul.f32 %v963_v9, %v1921_v17  ;;  %v981_v7 = vmul.f32 %v969_v27, %v1924_v18 }
 0x844   :  { %1031 = vmatpush1.bf16.msra.mxu0 %v984_v20 }
 0x845   :  { %v986_v11 = vpack.c.bf16 %v980_v13, %v978_v41  ;;  %v987_v16 = vpack.c.bf16 %v981_v7, %v979_v51 }
 0x847   :  { %1032 = vmatprep.subr.bf16.mxu0 %v987_v16 }
 0x848   :  { %1033 = vmatpush1.bf16.msra.mxu0 %v986_v11 }
 0x84a   :  { %v998_v63 = vpop.permute.xlu0 %997 }
 0x84b   :  { %1049 = vmatmul.mubr.bf16.vlgmr.msra.gmra.mrb[4].mxu0 %v1313_v12 }
 0x852   :  { %v1002_v23 = vpop.permute.xlu1 %1001 }
 0x91e   :  { %v1050_v47 = vpop.f32.mrb[4].mxu0 }
 0x91f   :  { %v1051_v26 = vadd.f32 %v1050_v47, %v998_v63  ;;  %v1052_v42 = vpop.f32.mrb[5].mxu0 }
 0x920   :  { %v1053_v8 = vadd.f32 %v1052_v42, %v998_v63  ;;  %v1054_v62 = vpop.f32.mrb[6].mxu0 }
 0x921   :  { %v2208_v17 = vadd.f32 %v1051_v26, %v1674_v54  ;;  %v1055_v18 = vadd.f32 %v1054_v62, %v1002_v23  ;;  %v1056_v35 = vpop.f32.mrb[7].mxu0 }
 0x922   :  { %v1060_v3 = vadd.f32 %v1053_v8, %v1676_v48  ;;  %v1057_v14 = vadd.f32 %v1056_v35, %v1002_v23  ;;  %v1424_v48 = vmov 8  }
 0x923   :  { %v1061_v36 = vadd.f32 %v1055_v18, %v1678_v50  ;;  %v1071_v21 = vmul.f32 %v2208_v17, %v2208_v17  ;;  %1302 = vset.pattern.permute.xlu1 %v1424_v48  ;;  %v1425_v50 = vmov 7  }
 0x924   :  { %v1062_v24 = vadd.f32 %v1057_v14, %v1680_v52  ;;  %v1063_v28 = vadd.f32 %v1060_v3, %v2208_v17  ;;  %v1072_v54 = vmul.f32 %v1060_v3, %v1060_v3  ;;  %1301 = vset.pattern.permute.xlu0 %v1425_v50 }
 0x925   :  { %v1073_v19 = vmul.f32 %v1061_v36, %v1061_v36 }
 0x926   :  { %1064 = vadd.xlane.f32.xlu1 %v1063_v28  ;;  %v1066_v31 = vadd.f32 %v1062_v24, %v1061_v36  ;;  %v1074_v60 = vmul.f32 %v1062_v24, %v1062_v24  ;;  %v1075_v38 = vadd.f32 %v1072_v54, %v1071_v21  ;;  %v1153_v54 = vld [vmem:[%s2261_s6] sm:$0x7] }
 0x928   :  { %1067 = vadd.xlane.f32.xlu0 %v1066_v31  ;;  %v1078_v5 = vadd.f32 %v1074_v60, %v1073_v19 }
 0x92a   :  { %1079 = vadd.xlane.f32.xlu1 %v1078_v5 }
 0x92c   :  { %1076 = vadd.xlane.f32.xlu0 %v1075_v38 }
 0x93b   :  { %1114 = vperm.xlu1 %1302, %v2105_v29  }
 0x93f   :  { %1303 = vset.pattern.permute.xlu1 %v1425_v50 }
 0x9b3   :  { %v1065_v52 = vpop.xlane.xlu1 %1064 }
 0x9b4   :  { %v1069_v59 = vmul.f32 0.00390625, %v1065_v52 }
 0x9b5   :  { %v1068_v43 = vpop.xlane.xlu0 %1067 }
 0x9b6   :  { %v1070_v56 = vmul.f32 0.00390625, %v1068_v43  ;;  %v1083_v32 = vmul.f32 %v1069_v59, %v1069_v59  ;;  %v1089_v58 = vsub.f32 %v2208_v17, %v1069_v59  ;;  %v1090_v6 = vsub.f32 %v1060_v3, %v1069_v59 }
 0x9b7   :  { %v1080_v10 = vpop.xlane.xlu1 %1079 }
 0x9b8   :  { %v1084_v39 = vmul.f32 %v1070_v56, %v1070_v56  ;;  %v1082_v46 = vmul.f32 0.00390625, %v1080_v10  ;;  %v1091_v33 = vsub.f32 %v1061_v36, %v1070_v56 }
 0x9b9   :  { %v1077_v57 = vpop.xlane.xlu0 %1076 }
 0x9ba   :  { %v1086_v55 = vsub.f32 %v1082_v46, %v1084_v39  ;;  %v1081_v22 = vmul.f32 0.00390625, %v1077_v57 }
 0x9bb   :  { %v1115_v53 = vpop.permute.xlu1 %1114 }
 0x9bc   :  { %v1088_v4 = vmax.f32 %v1086_v55, 0.0  ;;  %v1085_v1 = vsub.f32 %v1081_v22, %v1083_v32 }
 0x9be   :  { %v1094_v61 = vadd.f32 1e-05, %v1088_v4  ;;  %v1087_v40 = vmax.f32 %v1085_v1, 0.0 }
 0x9c0   :  { %1350 = vrsqrt.f32 %v1094_v61  ;;  %v1093_v37 = vadd.f32 1e-05, %v1087_v40 }
 0x9c2   :  { %1352 = vrsqrt.f32 %v1093_v37 }
 0x9ca   :  { %v1351_v34 = vpop.eup %1350 }
 0x9cb   :  { %v1098_v25 = vmul.f32 %v2113_v30, %v1351_v34 }
 0x9cc   :  { %v1353_v44 = vpop.eup %1352 }
 0x9cd   :  { %1106 = vperm.xlu1 %1303, %v1098_v25   ;;  %v1097_v49 = vmul.f32 %v2105_v29, %v1353_v44  ;;  %v1092_v29 = vsub.f32 %v1062_v24, %v1070_v56 }
 0x9cf   :  { %1101 = vperm.xlu0 %1301, %v1097_v49  }
 0x9d1   :  { %1304 = vset.pattern.permute.xlu1 %v1424_v48 }
 0x9d2   :  { %1118 = vperm.xlu1 %1304, %v2113_v30  }
 0x9d3   :  { %1306 = vset.pattern.permute.xlu0 %v1412_v2 }
 0x9d6   :  { %1305 = vset.pattern.permute.xlu1 %v1412_v2 }
 0x9d7   :  { %1158 = vperm.xlu1 %1305, %v44_v45  }
 0xa4c   :  { %v1107_v15 = vpop.permute.xlu1 %1106 }
 0xa4d   :  { %v1111_v30 = vmul.f32 %v1107_v15, %v1091_v33  ;;  %v1112_v27 = vmul.f32 %v1107_v15, %v1092_v29 }
 0xa4e   :  { %v1102_v0 = vpop.permute.xlu0 %1101 }
 0xa4f   :  { %v1109_v20 = vmul.f32 %v1102_v0, %v1089_v58  ;;  %v1110_v9 = vmul.f32 %v1102_v0, %v1090_v6 }
 0xa51   :  { %v1121_v41 = vadd.f32 %v1115_v53, %v1109_v20  ;;  %v1122_v51 = vadd.f32 %v1115_v53, %v1110_v9  ;;  %v1119_v2 = vpop.permute.xlu1 %1118 }
 0xa52   :  { %v1123_v13 = vadd.f32 %v1119_v2, %v1111_v30  ;;  %v1124_v7 = vadd.f32 %v1119_v2, %v1112_v27 }
 0xa53   :  { %v1129_v11 = vmin.f32 %v1121_v41, 0.0  ;;  %v1130_v16 = vmin.f32 %v1122_v51, 0.0  ;;  %vm1125_vm6 = vcmp.gt.f32.partialorder %v1121_v41, 0.0  ;;  %vm1126_vm7 = vcmp.gt.f32.partialorder %v1122_v51, 0.0 }
 0xa54   :  { %v1131_v12 = vmin.f32 %v1123_v13, 0.0  ;;  %v1132_v63 = vmin.f32 %v1124_v7, 0.0  ;;  %vm1127_vm8 = vcmp.gt.f32.partialorder %v1123_v13, 0.0  ;;  %vm1128_vm9 = vcmp.gt.f32.partialorder %v1124_v7, 0.0 }
 0xa55   :  { %v1133_v47 = vmul.f32 1.442695, %v1129_v11  ;;  %v1135_v23 = vmul.f32 1.442695, %v1130_v16 }
 0xa56   :  { %v1137_v26 = vmul.f32 1.442695, %v1131_v12  ;;  %v1139_v42 = vmul.f32 1.442695, %v1132_v63 }
 0xa57   :  { %1354 = vpow2.f32 %v1133_v47 }
 0xa58   :  { %1356 = vpow2.f32 %v1135_v23 }
 0xa59   :  { %1358 = vpow2.f32 %v1137_v26 }
 0xa5a   :  { %1360 = vpow2.f32 %v1139_v42 }
 0xa61   :  { %v1355_v8 = vpop.eup %1354 }
 0xa62   :  { %v1357_v62 = vpop.eup %1356  ;;  %v1261_v17 = vadd.f32 -1.0, %v1355_v8 }
 0xa63   :  { %v1359_v18 = vpop.eup %1358  ;;  %v1262_v35 = vadd.f32 -1.0, %v1357_v62 }
 0xa64   :  { %v1361_v3 = vpop.eup %1360  ;;  %v1145_v14 = vsel %vm1125_vm6, %v1121_v41, %v1261_v17  ;;  %v1263_v36 = vadd.f32 -1.0, %v1359_v18 }
 0xa65   :  { %1149 = vst [vmem:[#allocation4] sm:$0xff] %v1145_v14  ;;  %v1264_v24 = vadd.f32 -1.0, %v1361_v3  ;;  %v1146_v28 = vsel %vm1126_vm7, %v1122_v51, %v1262_v35 }
 0xa66   :  { %v1147_v19 = vsel %vm1127_vm8, %v1123_v13, %v1263_v36  ;;  %1150 = vst [vmem:[#allocation4 + $0x8] sm:$0xff] %v1146_v28 }
 0xa67   :  { %1151 = vst [vmem:[#allocation4 + $0x10] sm:$0xff] %v1147_v19  ;;  %v1154_v31 = vpack.c.bf16 %v1147_v19, %v1145_v14  ;;  %v1148_v60 = vsel %vm1128_vm9, %v1124_v7, %v1264_v24 }
 0xa68   :  { %1152 = vst [vmem:[#allocation4 + $0x18] sm:$0xff] %v1148_v60  ;;  %v1155_v21 = vpack.c.bf16 %v1148_v60, %v1146_v28 }
 0xa6a   :  { %1164 = vmatprep.subr.bf16.mxu1 %v1155_v21 }
 0xa6b   :  { %1165 = vmatpush1.bf16.msra.mxu1 %v1154_v31 }
 0xa6e   :  { %1265 = vmatmul.mubr.msk.bf16.vlgmr.msra.gmra.mrb[4].mxu1 %vm715_vm15, %v1153_v54 }
 0xa6f   :  { %1375 = shalt.err (!%p1372_p4)
}
 0xa70   :  { %s1376_s17 = scalar_lea.hbm %s2264_s9, 512 }
 0xa71   :  { %p1377_p5 = scmp.ne.s32.totalorder %s2264_s9, %s1376_s17  ;;  %p1380_p6 = scmp.lt.u32.totalorder %s1376_s17, %s2264_s9 }
 0xa73   :  { %p1382_p7 = pnand %p1380_p6, %p1377_p5 }
 0xa75   :  { %1385 = shalt.err (!%p1382_p7)
}
 0xa76   :  { %s1427_s0 = smov 256   ;;  %v1159_v5 = vpop.permute.xlu1 %1158  ;;  %s1428_s1 = smov [#allocation2]  }
 0xa77   :  { %1228 = dma.vmem_to_hbm [thread:$0]  %s1223_s13, 512, %s2264_s9, [#allocation5], %s1427_s0, %s1427_s0, %s1416_s3  }
 0xa78   :  { %s1213_s22 = sshll.u32 %s1428_s1, 4  ;;  %s1214_s22 = int_to_ptr.vmem [resolvable:$true] %s1213_s22 }
 0xa79   :  { %s1386_s23 = scalar_lea.vmem %s1214_s22, 256  ;;  %p1391_p9 = scmp.lt.s32.totalorder %s1214_s22, %s1214_s22 }
 0xa7a   :  { %p1387_p8 = scmp.ne.s32.totalorder %s1214_s22, %s1386_s23  ;;  %p1392_p10 = scmp.lt.s32.totalorder %s1386_s23, %s1386_s23 }
 0xa7c   :  { %p1393_p11 = por %p1392_p10, %p1391_p9 }
 0xa7e   :  { %p1394_p12 = pnand %p1393_p11, %p1387_p8 }
 0xb41   :  { %v1198_v38 = vpop.f32.mrb[4].mxu1 }
 0xb42   :  { %v1200_v48 = vpop.f32.mrb[5].mxu1  ;;  %v1199_v50 = vadd.f32 %v1198_v38, %v1159_v5 }
 0xb43   :  { %v1202_v52 = vpop.f32.mrb[6].mxu1  ;;  %v1201_v43 = vadd.f32 %v1200_v48, %v1159_v5 }
 0xb44   :  { %v1203_v59 = vpop.f32.mrb[7].mxu1  ;;  %1205 = vst [vmem:[#allocation2] sm:$0x3f] %v1199_v50 }
 0xb45   :  { %1206 = vst [vmem:[#allocation2 + $0x8] sm:$0x3f] %v1201_v43 }
 0xb46   :  { %1397 = shalt.err (!%p1394_p12)
}
 0xb47   :  { %s1398_s4 = scalar_lea.hbm %s2263_s8, 256 }
 0xb48   :  { %p1399_p13 = scmp.ne.s32.totalorder %s2263_s8, %s1398_s4  ;;  %p1402_p0 = scmp.lt.u32.totalorder %s1398_s4, %s2263_s8 }
 0xb4a   :  { %p1404_p1 = pnand %p1402_p0, %p1399_p13 }
 0xb4c   :  { %1407 = shalt.err (!%p1404_p1)
}
 0xb4d   :  { %1216 = dma.vmem_to_hbm [thread:$0]  %s1214_s22, 256, %s2263_s8, [#allocation3]  }
 0xb4e   :  { %1408 = dma.done.wait [#allocation3], 256  }
 0xb4f   :  { %1409 = vsyncadd [#allocation3], 4294967040 }
 0xb50   :  { %1410 = dma.done.wait [#allocation5], 512  }
 0xb51   :  { %1411 = vsyncadd [#allocation5], 4294966784 }
 0xb52   :  { %1235 = vsyncpa [#allocation3], 1 }
 0xb53   :  { %1236 = vsyncpa [#allocation5], 1 }

</bundles_post_ra>
